<compile_context>
chip_gen: v7x
topology: tpu7x:2x2x1
jax: 0.10.0
libtpu: 0.0.40
codegen_flags: <defaults>
</compile_context>

<pallas_src>
import jax
import jax.numpy as jnp
from jax.experimental import pallas as pl
from jax.experimental.pallas import tpu as pltpu


def sentinel_kernel(x_ref, h_ref, mem_ref, w_ref, out_ref):
    # x_ref:   (tb, H)    x_t tile, bf16
    # h_ref:   (tb, I)    h_{t-1} tile, bf16
    # mem_ref: (tb, H)    memory-cell tile, bf16
    # w_ref:   (H+I, H)   fused [x2s.weight^T ; h2s.weight^T], bf16, resident
    H = x_ref.shape[1]
    x = x_ref[...].astype(w_ref.dtype)
    h = h_ref[...].astype(w_ref.dtype)
    # Two accumulated MXU dots on static weight slices (replaces the concat:
    # no (tb, H+I) intermediate in VMEM, no extra vld/vst or vreg pressure).
    logits = jnp.dot(x, w_ref[:H, :], preferred_element_type=jnp.float32)
    logits = logits + jnp.dot(h, w_ref[H:, :], preferred_element_type=jnp.float32)
    # Epilogue in f32: portable to v5e (no bf16 VPU/EUP); accumulator is f32
    # already so this costs no extra HBM traffic.
    gate_s = jax.nn.sigmoid(logits)                            # EUP logistic
    s = gate_s * jnp.tanh(mem_ref[...].astype(jnp.float32))    # EUP tanh
    out_ref[...] = s.astype(out_ref.dtype)


def prepare_sentinel_weights(w_x2s, w_h2s, dtype=jnp.bfloat16):
    """Done ONCE at init (not per forward call).

    w_x2s: (H, H) PyTorch (out, in) layout of x2s.weight.
    w_h2s: (H, I) PyTorch (out, in) layout of h2s.weight.
    Returns fused (H + I, H) matrix so the kernel computes
        x @ w_fused[:H] + h @ w_fused[H:].
    """
    return jnp.concatenate([w_x2s.T, w_h2s.T], axis=0).astype(dtype)


def _round_up(a, m):
    return (a + m - 1) // m * m


def sentinel_forward(x_t, h_t_1, mem_t, w_fused, *, tb=512):
    """Pallas Sentinel.forward (eval-mode: dropout == identity).

    x_t:     (B, H)   preferably bf16 (f32 accepted; cast once here)
    h_t_1:   (B, I)
    mem_t:   (B, H)
    w_fused: (H + I, H) from prepare_sentinel_weights().

    tb: batch-row tile.  Default 512 (v5e/v6e single-TC roofline sweet spot);
    on v7x with large B this still yields >=4 "parallel" grid steps so both
    TensorCores get >=2 pipelined steps each.  For tiny B the call is
    launch-bound regardless — fuse the RNN time loop instead (see TODO).
    """
    B, H = x_t.shape
    I = h_t_1.shape[1]
    assert w_fused.shape == (H + I, H), (w_fused.shape, H, I)

    # Stream activations/output as bf16 — halves HBM bytes of this mem-bound
    # kernel.  If the caller already passes bf16 these casts are no-ops.
    stream_dtype = jnp.bfloat16
    x_t = x_t.astype(stream_dtype)
    h_t_1 = h_t_1.astype(stream_dtype)
    mem_t = mem_t.astype(stream_dtype)

    # Tile selection: keep large sublane-aligned tiles; PAD the batch up to a
    # multiple of tb for awkward B instead of shrinking tb (tiny tiles make the
    # ~0.35us/step overhead dominate).
    tb = _round_up(max(8, min(int(tb), _round_up(B, 8))), 8)
    B_pad = _round_up(B, tb)
    if B_pad != B:
        pad = ((0, B_pad - B), (0, 0))
        x_t = jnp.pad(x_t, pad)
        h_t_1 = jnp.pad(h_t_1, pad)
        mem_t = jnp.pad(mem_t, pad)
    grid = (B_pad // tb,)

    out_bytes = B_pad * H * jnp.dtype(stream_dtype).itemsize
    cost = pl.CostEstimate(
        flops=2 * B_pad * (H + I) * H,
        transcendentals=2 * B_pad * H,  # sigmoid + tanh
        bytes_accessed=x_t.nbytes + h_t_1.nbytes + mem_t.nbytes
        + w_fused.nbytes + out_bytes,
    )

    def _build(w_spec):
        return pl.pallas_call(
            sentinel_kernel,
            out_shape=jax.ShapeDtypeStruct((B_pad, H), stream_dtype),
            grid=grid,
            in_specs=[
                pl.BlockSpec((tb, H), lambda i: (i, 0)),   # x_t   (streamed)
                pl.BlockSpec((tb, I), lambda i: (i, 0)),   # h_t_1 (streamed)
                pl.BlockSpec((tb, H), lambda i: (i, 0)),   # mem_t (streamed)
                w_spec,                                    # fused weight (resident)
            ],
            out_specs=pl.BlockSpec((tb, H), lambda i: (i, 0)),
            compiler_params=pltpu.CompilerParams(
                dimension_semantics=("parallel",),
                vmem_limit_bytes=32 * 1024 * 1024,
            ),
            cost_estimate=cost,
        )

    try:
        # Constant index_map -> one VMEM buffer is enough for the weight
        # (halves its footprint; relevant on v7x's 64 MiB VMEM at large H).
        w_spec = pl.BlockSpec((H + I, H), lambda i: (0, 0),
                              pipeline_mode=pl.Buffered(1))
        out = _build(w_spec)(x_t, h_t_1, mem_t, w_fused)
    except Exception:
        # Fallback for jax versions without pipeline_mode / single-buffering.
        w_spec = pl.BlockSpec((H + I, H), lambda i: (0, 0))
        out = _build(w_spec)(x_t, h_t_1, mem_t, w_fused)

    return out[:B] if B_pad != B else out


def xavier_uniform(key, shape):
    # PyTorch init.xavier_uniform for a Linear weight (out, in):
    # bound = sqrt(6 / (fan_in + fan_out))
    fan_out, fan_in = shape
    bound = jnp.sqrt(6.0 / (fan_in + fan_out))
    return jax.random.uniform(key, shape, jnp.float32, -bound, bound)


if __name__ == "__main__":
    # Small but lane-dense shapes: feature dims are multiples of 128 so every
    # vreg / MXU column is fully used.
    B, I, H = 256, 128, 128
    key = jax.random.PRNGKey(0)
    k1, k2, k3, k4, k5 = jax.random.split(key, 5)

    # Parameters (deterministic xavier-uniform init, PyTorch (out, in) layout).
    w_h2s = xavier_uniform(k1, (H, I))   # h2s: Linear(input_size -> hidden), bias=False
    w_x2s = xavier_uniform(k2, (H, H))   # x2s: Linear(hidden -> hidden),     bias=False

    # Fuse / transpose / cast ONCE at init.
    w_fused = prepare_sentinel_weights(w_x2s, w_h2s, dtype=jnp.bfloat16)

    # Activations created directly in bf16 (what the surrounding model would
    # stream), so the wrapper's .astype casts are no-ops.
    x_t = jax.random.normal(k3, (B, H), jnp.float32).astype(jnp.bfloat16)
    h_t_1 = jax.random.normal(k4, (B, I), jnp.float32).astype(jnp.bfloat16)
    mem_t = jax.random.normal(k5, (B, H), jnp.float32).astype(jnp.bfloat16)

    out = sentinel_forward(x_t, h_t_1, mem_t, w_fused)
    out = jax.block_until_ready(out)

    # Reference (eval-mode dropout == identity) with the same bf16 operands
    # and f32 accumulation / epilogue as the kernel.
    logits_ref = (x_t.astype(jnp.float32) @ w_fused[:H].astype(jnp.float32)
                  + h_t_1.astype(jnp.float32) @ w_fused[H:].astype(jnp.float32))
    ref = jax.nn.sigmoid(logits_ref) * jnp.tanh(mem_t.astype(jnp.float32))
    err = float(jnp.max(jnp.abs(out.astype(jnp.float32) - ref)))
    assert err < 2e-2, err

    print("KERNEL_OK")
</pallas_src>

<mosaic_0001>
module attributes {stable_mosaic.version = 11 : i64} {
  func.func @sentinel_kernel(%arg0: i32, %arg1: memref<256x128xbf16, #tpu.memory_space<vmem>>, %arg2: memref<256x128xbf16, #tpu.memory_space<vmem>>, %arg3: memref<256x128xbf16, #tpu.memory_space<vmem>>, %arg4: memref<256x128xbf16, #tpu.memory_space<vmem>>, %arg5: memref<256x128xbf16, #tpu.memory_space<vmem>>) attributes {dimension_semantics = [#tpu.dimension_semantics<parallel>], iteration_bounds = array<i64: 1>, scalar_prefetch = 0 : i64, scratch_operands = 0 : i64, tpu.core_type = #tpu.core_type<tc>, window_params = [{transform_indices = @transform_0, window_bounds = array<i64: 256, 128>}, {transform_indices = @transform_1, window_bounds = array<i64: 256, 128>}, {transform_indices = @transform_2, window_bounds = array<i64: 256, 128>}, {pipeline_mode = #tpu.pipeline_mode<synchronous>, transform_indices = @transform_3, window_bounds = array<i64: 256, 128>}, {transform_indices = @transform_4, window_bounds = array<i64: 256, 128>}]} {
    %c0 = arith.constant 0 : index
    %c0_0 = arith.constant 0 : index
    %0 = vector.load %arg1[%c0, %c0_0] : memref<256x128xbf16, #tpu.memory_space<vmem>>, vector<256x128xbf16>
    %c0_1 = arith.constant 0 : index
    %c0_2 = arith.constant 0 : index
    %1 = vector.load %arg2[%c0_1, %c0_2] : memref<256x128xbf16, #tpu.memory_space<vmem>>, vector<256x128xbf16>
    %c0_3 = arith.constant 0 : index
    %c0_4 = arith.constant 0 : index
    %2 = vector.load %arg4[%c0_3, %c0_4] : memref<256x128xbf16, #tpu.memory_space<vmem>>, vector<128x128xbf16>
    %cst = arith.constant dense<0.000000e+00> : vector<256x128xf32>
    %3 = tpu.matmul %0, %2, %cst {dimension_numbers = #tpu.dot_dimension_numbers<[1], [0], [0], [1], [0, 0, 1, 1], [], []>} : vector<256x128xbf16>, vector<128x128xbf16>, vector<256x128xf32> -> vector<256x128xf32>
    %c128 = arith.constant 128 : index
    %c0_5 = arith.constant 0 : index
    %4 = vector.load %arg4[%c128, %c0_5] : memref<256x128xbf16, #tpu.memory_space<vmem>>, vector<128x128xbf16>
    %cst_6 = arith.constant dense<0.000000e+00> : vector<256x128xf32>
    %5 = tpu.matmul %1, %4, %cst_6 {dimension_numbers = #tpu.dot_dimension_numbers<[1], [0], [0], [1], [0, 0, 1, 1], [], []>} : vector<256x128xbf16>, vector<128x128xbf16>, vector<256x128xf32> -> vector<256x128xf32>
    %6 = arith.addf %3, %5 : vector<256x128xf32>
    %7 = arith.negf %6 : vector<256x128xf32>
    %8 = math.exp %7 : vector<256x128xf32>
    %cst_7 = arith.constant 1.000000e+00 : f32
    %9 = vector.broadcast %cst_7 : f32 to vector<256x128xf32>
    %10 = arith.addf %9, %8 : vector<256x128xf32>
    %11 = arith.divf %9, %10 : vector<256x128xf32>
    %c0_8 = arith.constant 0 : index
    %c0_9 = arith.constant 0 : index
    %12 = vector.load %arg3[%c0_8, %c0_9] : memref<256x128xbf16, #tpu.memory_space<vmem>>, vector<256x128xbf16>
    %13 = arith.extf %12 : vector<256x128xbf16> to vector<256x128xf32>
    %14 = math.tanh %13 : vector<256x128xf32>
    %15 = arith.mulf %11, %14 : vector<256x128xf32>
    %16 = arith.truncf %15 : vector<256x128xf32> to vector<256x128xbf16>
    %c0_10 = arith.constant 0 : index
    %c0_11 = arith.constant 0 : index
    %17 = vector.load %arg5[%c0_10, %c0_11] : memref<256x128xbf16, #tpu.memory_space<vmem>>, vector<256x128xbf16>
    tpu.vector_store %arg5[%c0_10, %c0_11], %16 {strides = array<i32>} : memref<256x128xbf16, #tpu.memory_space<vmem>>, vector<256x128xbf16>,
    return
  }
  func.func @transform_0(%arg0: i32) -> (i32, i32) {
    %c0_i32 = arith.constant 0 : i32
    %c0_i32_0 = arith.constant 0 : i32
    return %arg0, %c0_i32 : i32, i32
  }
  func.func @transform_1(%arg0: i32) -> (i32, i32) {
    %c0_i32 = arith.constant 0 : i32
    %c0_i32_0 = arith.constant 0 : i32
    return %arg0, %c0_i32 : i32, i32
  }
  func.func @transform_2(%arg0: i32) -> (i32, i32) {
    %c0_i32 = arith.constant 0 : i32
    %c0_i32_0 = arith.constant 0 : i32
    return %arg0, %c0_i32 : i32, i32
  }
  func.func @transform_3(%arg0: i32) -> (i32, i32) {
    %c0_i32 = arith.constant 0 : i32
    %c0_i32_0 = arith.constant 0 : i32
    %c0_i32_1 = arith.constant 0 : i32
    return %c0_i32, %c0_i32_0 : i32, i32
  }
  func.func @transform_4(%arg0: i32) -> (i32, i32) {
    %c0_i32 = arith.constant 0 : i32
    %c0_i32_0 = arith.constant 0 : i32
    return %arg0, %c0_i32 : i32, i32
  }
}

module attributes {stable_mosaic.version = 11 : i64} {
  func.func @sentinel_kernel(%arg0: i32, %arg1: memref<256x128xbf16, #tpu.memory_space<vmem>>, %arg2: memref<256x128xbf16, #tpu.memory_space<vmem>>, %arg3: memref<256x128xbf16, #tpu.memory_space<vmem>>, %arg4: memref<256x128xbf16, #tpu.memory_space<vmem>>, %arg5: memref<256x128xbf16, #tpu.memory_space<vmem>>) attributes {dimension_semantics = [#tpu.dimension_semantics<parallel>], iteration_bounds = array<i64: 1>, scalar_prefetch = 0 : i64, scratch_operands = 0 : i64, tpu.core_type = #tpu.core_type<tc>, window_params = [{transform_indices = @transform_0, window_bounds = array<i64: 256, 128>}, {transform_indices = @transform_1, window_bounds = array<i64: 256, 128>}, {transform_indices = @transform_2, window_bounds = array<i64: 256, 128>}, {pipeline_mode = #tpu.pipeline_mode<synchronous>, transform_indices = @transform_3, window_bounds = array<i64: 256, 128>}, {transform_indices = @transform_4, window_bounds = array<i64: 256, 128>}]} {
    %c0 = arith.constant 0 : index
    %c0_0 = arith.constant 0 : index
    %0 = vector.load %arg1[%c0, %c0_0] : memref<256x128xbf16, #tpu.memory_space<vmem>>, vector<256x128xbf16>
    %c0_1 = arith.constant 0 : index
    %c0_2 = arith.constant 0 : index
    %1 = vector.load %arg2[%c0_1, %c0_2] : memref<256x128xbf16, #tpu.memory_space<vmem>>, vector<256x128xbf16>
    %c0_3 = arith.constant 0 : index
    %c0_4 = arith.constant 0 : index
    %2 = vector.load %arg4[%c0_3, %c0_4] : memref<256x128xbf16, #tpu.memory_space<vmem>>, vector<128x128xbf16>
    %cst = arith.constant dense<0.000000e+00> : vector<256x128xf32>
    %3 = tpu.matmul %0, %2, %cst {dimension_numbers = #tpu.dot_dimension_numbers<[1], [0], [0], [1], [0, 0, 1, 1], [], []>} : vector<256x128xbf16>, vector<128x128xbf16>, vector<256x128xf32> -> vector<256x128xf32>
    %c128 = arith.constant 128 : index
    %c0_5 = arith.constant 0 : index
    %4 = vector.load %arg4[%c128, %c0_5] : memref<256x128xbf16, #tpu.memory_space<vmem>>, vector<128x128xbf16>
    %cst_6 = arith.constant dense<0.000000e+00> : vector<256x128xf32>
    %5 = tpu.matmul %1, %4, %cst_6 {dimension_numbers = #tpu.dot_dimension_numbers<[1], [0], [0], [1], [0, 0, 1, 1], [], []>} : vector<256x128xbf16>, vector<128x128xbf16>, vector<256x128xf32> -> vector<256x128xf32>
    %6 = arith.addf %3, %5 : vector<256x128xf32>
    %7 = arith.negf %6 : vector<256x128xf32>
    %8 = math.exp %7 : vector<256x128xf32>
    %cst_7 = arith.constant 1.000000e+00 : f32
    %9 = vector.broadcast %cst_7 : f32 to vector<256x128xf32>
    %10 = arith.addf %9, %8 : vector<256x128xf32>
    %11 = arith.divf %9, %10 : vector<256x128xf32>
    %c0_8 = arith.constant 0 : index
    %c0_9 = arith.constant 0 : index
    %12 = vector.load %arg3[%c0_8, %c0_9] : memref<256x128xbf16, #tpu.memory_space<vmem>>, vector<256x128xbf16>
    %13 = arith.extf %12 : vector<256x128xbf16> to vector<256x128xf32>
    %14 = math.tanh %13 : vector<256x128xf32>
    %15 = arith.mulf %11, %14 : vector<256x128xf32>
    %16 = arith.truncf %15 : vector<256x128xf32> to vector<256x128xbf16>
    %c0_10 = arith.constant 0 : index
    %c0_11 = arith.constant 0 : index
    %17 = vector.load %arg5[%c0_10, %c0_11] : memref<256x128xbf16, #tpu.memory_space<vmem>>, vector<256x128xbf16>
    tpu.vector_store %arg5[%c0_10, %c0_11], %16 {strides = array<i32>} : memref<256x128xbf16, #tpu.memory_space<vmem>>, vector<256x128xbf16>,
    return
  }
  func.func @transform_0(%arg0: i32) -> (i32, i32) {
    %c0_i32 = arith.constant 0 : i32
    %c0_i32_0 = arith.constant 0 : i32
    return %arg0, %c0_i32 : i32, i32
  }
  func.func @transform_1(%arg0: i32) -> (i32, i32) {
    %c0_i32 = arith.constant 0 : i32
    %c0_i32_0 = arith.constant 0 : i32
    return %arg0, %c0_i32 : i32, i32
  }
  func.func @transform_2(%arg0: i32) -> (i32, i32) {
    %c0_i32 = arith.constant 0 : i32
    %c0_i32_0 = arith.constant 0 : i32
    return %arg0, %c0_i32 : i32, i32
  }
  func.func @transform_3(%arg0: i32) -> (i32, i32) {
    %c0_i32 = arith.constant 0 : i32
    %c0_i32_0 = arith.constant 0 : i32
    %c0_i32_1 = arith.constant 0 : i32
    return %c0_i32, %c0_i32_0 : i32, i32
  }
  func.func @transform_4(%arg0: i32) -> (i32, i32) {
    %c0_i32 = arith.constant 0 : i32
    %c0_i32_0 = arith.constant 0 : i32
    return %arg0, %c0_i32 : i32, i32
  }
}

</mosaic_0001>

<bundles_post_ra>
// kernel: tpu_custom_call.1
= control target key start
LH: loop header
LB: loop body
LE: loop exit
PB: predicated region body
PF: predicated region fallthrough
CT: control target
= control target key end

     0   :  { %9 = vsyncpa [#allocation3], 0  ;;  %s2348_s0 = inlined_call_operand.hbm [shape: bf16[256,128], index: 0, kind: input, shape index: {}]   ;;  %s2349_s1 = inlined_call_operand.hbm [shape: bf16[256,128], index: 1, kind: input, shape index: {}]   ;;  %s2350_s2 = inlined_call_operand.hbm [shape: bf16[256,128], index: 2, kind: input, shape index: {}]   ;;  %s2351_s3 = inlined_call_operand.hbm [shape: bf16[256,128], index: 3, kind: input, shape index: {}]   ;;  %s2352_s4 = inlined_call_operand.hbm [shape: bf16[256,128], index: 4, kind: output, shape index: {}]  }
   0x1   :  { %10 = vsyncpa [#allocation6], 0 }
   0x2   :  { %11 = vsyncpa [#allocation9], 0 }
   0x3   :  { %12 = vsyncpa [#allocation4], 0  ;;  %s2138_s15 = smov [#allocation5]   ;;  %s2139_s17 = smov [#allocation2]  }
   0x4   :  { %s30_s16 = sshll.u32 %s2138_s15, 4  ;;  %s18_s18 = sshll.u32 %s2139_s17, 4  ;;  %s31_s16 = int_to_ptr.vmem [resolvable:$true] %s30_s16  ;;  %s2170_s18 = int_to_ptr.vmem [resolvable:$true] %s18_s18 }
   0x5   :  { %s2020_s21 = scalar_lea.hbm %s2349_s1, 2048 }
   0x6   :  { %p2021_p0 = scmp.ne.s32.totalorder %s2349_s1, %s2020_s21  ;;  %p2024_p1 = scmp.lt.u32.totalorder %s2020_s21, %s2349_s1 }
   0x8   :  { %p2026_p2 = pnand %p2024_p1, %p2021_p0 }
   0xa   :  { %2029 = shalt.err (!%p2026_p2)
}
   0xb   :  { %s2030_s26 = scalar_lea.vmem %s31_s16, 2048  ;;  %p2035_p4 = scmp.lt.s32.totalorder %s31_s16, %s31_s16 }
   0xc   :  { %p2031_p3 = scmp.ne.s32.totalorder %s31_s16, %s2030_s26  ;;  %p2036_p5 = scmp.lt.s32.totalorder %s2030_s26, %s2030_s26 }
   0xe   :  { %p2037_p6 = por %p2036_p5, %p2035_p4 }
  0x10   :  { %p2038_p7 = pnand %p2037_p6, %p2031_p3 }
  0x12   :  { %2041 = shalt.err (!%p2038_p7)
}
  0x13   :  { %s2140_s27 = smov 64   ;;  %s2141_s28 = smov 4  }
  0x14   :  { %36 = dma.hbm_to_vmem [thread:$0]  %s2349_s1, 2048, %s31_s16, [#allocation6], %s2140_s27, %s2140_s27, %s2141_s28  }
  0x15   :  { %s2042_s7 = scalar_lea.hbm %s2348_s0, 2048 }
  0x16   :  { %p2043_p8 = scmp.ne.s32.totalorder %s2348_s0, %s2042_s7  ;;  %p2046_p9 = scmp.lt.u32.totalorder %s2042_s7, %s2348_s0 }
  0x18   :  { %p2048_p10 = pnand %p2046_p9, %p2043_p8 }
  0x1a   :  { %2051 = shalt.err (!%p2048_p10)
}
  0x1b   :  { %s2052_s12 = scalar_lea.vmem %s2170_s18, 2048  ;;  %p2057_p12 = scmp.lt.s32.totalorder %s2170_s18, %s2170_s18 }
  0x1c   :  { %p2053_p11 = scmp.ne.s32.totalorder %s2170_s18, %s2052_s12  ;;  %p2058_p13 = scmp.lt.s32.totalorder %s2052_s12, %s2052_s12 }
  0x1e   :  { %p2059_p0 = por %p2058_p13, %p2057_p12 }
  0x20   :  { %p2060_p1 = pnand %p2059_p0, %p2053_p11 }
  0x22   :  { %2063 = shalt.err (!%p2060_p1)
}
  0x23   :  { %24 = dma.hbm_to_vmem [thread:$0]  %s2348_s0, 2048, %s2170_s18, [#allocation3], %s2140_s27, %s2140_s27, %s2141_s28  }
  0x24   :  { %s2142_s14 = smov [#allocation7]   ;;  %s2143_s16 = smov [#allocation8]  }
  0x25   :  { %s42_s15 = sshll.u32 %s2142_s14, 4  ;;  %s54_s17 = sshll.u32 %s2143_s16, 4  ;;  %s43_s15 = int_to_ptr.vmem [resolvable:$true] %s42_s15  ;;  %s2207_s17 = int_to_ptr.vmem [resolvable:$true] %s54_s17 }
  0x26   :  { %s2064_s21 = scalar_lea.hbm %s2350_s2, 2048 }
  0x27   :  { %p2065_p2 = scmp.ne.s32.totalorder %s2350_s2, %s2064_s21  ;;  %p2068_p3 = scmp.lt.u32.totalorder %s2064_s21, %s2350_s2 }
  0x29   :  { %p2070_p4 = pnand %p2068_p3, %p2065_p2 }
  0x2b   :  { %2073 = shalt.err (!%p2070_p4)
}
  0x2c   :  { %s2074_s0 = scalar_lea.vmem %s43_s15, 2048  ;;  %p2079_p6 = scmp.lt.s32.totalorder %s43_s15, %s43_s15 }
  0x2d   :  { %p2075_p5 = scmp.ne.s32.totalorder %s43_s15, %s2074_s0  ;;  %p2080_p7 = scmp.lt.s32.totalorder %s2074_s0, %s2074_s0 }
  0x2f   :  { %p2081_p8 = por %p2080_p7, %p2079_p6 }
  0x31   :  { %p2082_p9 = pnand %p2081_p8, %p2075_p5 }
  0x33   :  { %2085 = shalt.err (!%p2082_p9)
}
  0x34   :  { %48 = dma.hbm_to_vmem [thread:$0]  %s2350_s2, 2048, %s43_s15, [#allocation6], %s2140_s27, %s2140_s27, %s2141_s28  }
  0x35   :  { %s2086_s5 = scalar_lea.hbm %s2351_s3, 2048 }
  0x36   :  { %p2087_p10 = scmp.ne.s32.totalorder %s2351_s3, %s2086_s5  ;;  %p2090_p11 = scmp.lt.u32.totalorder %s2086_s5, %s2351_s3 }
  0x38   :  { %p2092_p12 = pnand %p2090_p11, %p2087_p10 }
  0x3a   :  { %2095 = shalt.err (!%p2092_p12)
}
  0x3b   :  { %s2096_s10 = scalar_lea.vmem %s2207_s17, 2048  ;;  %p2101_p0 = scmp.lt.s32.totalorder %s2207_s17, %s2207_s17 }
  0x3c   :  { %p2097_p13 = scmp.ne.s32.totalorder %s2207_s17, %s2096_s10  ;;  %p2102_p1 = scmp.lt.s32.totalorder %s2096_s10, %s2096_s10 }
  0x3e   :  { %p2103_p2 = por %p2102_p1, %p2101_p0 }
  0x40   :  { %p2104_p3 = pnand %p2103_p2, %p2097_p13 }
  0x42   :  { %2107 = shalt.err (!%p2104_p3)
}
  0x43   :  { %60 = dma.hbm_to_vmem [thread:$0]  %s2351_s3, 2048, %s2207_s17, [#allocation9], %s2140_s27, %s2140_s27, %s2141_s28  }
  0x44   :  { %2130 = dma.done.wait [#allocation3], 2048  }
  0x45   :  { %2131 = vsyncadd [#allocation3], 4294965248 }
  0x46   :  { %2132 = dma.done.wait [#allocation6], 4096  }
  0x47   :  { %2133 = vsyncadd [#allocation6], 4294963200 }
  0x48   :  { %2134 = dma.done.wait [#allocation9], 2048  }
  0x49   :  { %2135 = vsyncadd [#allocation9], 4294965248  ;;  %v1780_v0 = vld [vmem:[#allocation8 + $0x40] sm:$0xff]   ;;  %v1782_v2 = vld [vmem:[#allocation8 + $0x48] sm:$0xff]   ;;  %s2144_s3 = smov [#allocation10]  }
  0x4a   :  { %v1781_v1 = vld [vmem:[#allocation8] sm:$0xff]   ;;  %1645 = vmatprep.subr.bf16.mxu1 %v1780_v0  ;;  %v1783_v3 = vld [vmem:[#allocation8 + $0x8] sm:$0xff]   ;;  %v1784_v4 = vld [vmem:[#allocation8 + $0x50] sm:$0xff]   ;;  %s1265_s12 = sshll.u32 %s2144_s3, 4  ;;  %s1266_s12 = int_to_ptr.vmem [resolvable:$true] %s1265_s12 }
  0x4b   :  { %1693 = vmatprep.subr.bf16.mxu0 %v1781_v1  ;;  %1646 = vmatpush3.bf16.msra.mxu1 %v1780_v0  ;;  %v1785_v5 = vld [vmem:[#allocation8 + $0x10] sm:$0xff]   ;;  %v1786_v6 = vld [vmem:[#allocation8 + $0x58] sm:$0xff]   ;;  %v1788_v8 = vld [vmem:[#allocation8 + $0x60] sm:$0xff]   ;;  %s2108_s1 = scalar_lea.vmem %s1266_s12, 2048  ;;  %p2113_p5 = scmp.lt.s32.totalorder %s1266_s12, %s1266_s12 }
  0x4c   :  { %1694 = vmatpush3.bf16.msra.mxu0 %v1781_v1  ;;  %1647 = vmatprep.subr.bf16.mxu1 %v1782_v2  ;;  %v1787_v7 = vld [vmem:[#allocation8 + $0x18] sm:$0xff]   ;;  %v1789_v9 = vld [vmem:[#allocation8 + $0x20] sm:$0xff]   ;;  %v1790_v10 = vld [vmem:[#allocation8 + $0x68] sm:$0xff]   ;;  %p2109_p4 = scmp.ne.s32.totalorder %s1266_s12, %s2108_s1  ;;  %p2114_p6 = scmp.lt.s32.totalorder %s2108_s1, %s2108_s1 }
  0x4d   :  { %1695 = vmatprep.subr.bf16.mxu0 %v1783_v3  ;;  %v1791_v11 = vld [vmem:[#allocation8 + $0x28] sm:$0xff]   ;;  %v1796_v12 = vld [vmem:[#allocation5] sm:$0xff]   ;;  %v1792_v14 = vld [vmem:[#allocation8 + $0x70] sm:$0xff]  }
  0x4e   :  { %v1797_v13 = vld [vmem:[#allocation2] sm:$0xff]   ;;  %1661 = vmatprep.mubr.bf16.mxu1 %v1796_v12  ;;  %v1793_v15 = vld [vmem:[#allocation8 + $0x30] sm:$0xff]   ;;  %v1794_v16 = vld [vmem:[#allocation8 + $0x78] sm:$0xff]   ;;  %p2115_p7 = por %p2114_p6, %p2113_p5 }
  0x4f   :  { %1648 = vmatpush3.bf16.msra.mxu1 %v1782_v2  ;;  %1709 = vmatprep.mubr.bf16.mxu0 %v1797_v13  ;;  %v1795_v17 = vld [vmem:[#allocation8 + $0x38] sm:$0xff]   ;;  %v1798_v18 = vld [vmem:[#allocation5 + $0x8] sm:$0xff]   ;;  %v1800_v20 = vld [vmem:[#allocation5 + $0x10] sm:$0xff]  }
  0x50   :  { %1696 = vmatpush3.bf16.msra.mxu0 %v1783_v3  ;;  %1649 = vmatprep.subr.bf16.mxu1 %v1784_v4  ;;  %v1799_v19 = vld [vmem:[#allocation2 + $0x8] sm:$0xff]   ;;  %v1801_v21 = vld [vmem:[#allocation2 + $0x10] sm:$0xff]   ;;  %v1802_v22 = vld [vmem:[#allocation5 + $0x18] sm:$0xff]   ;;  %p2116_p8 = pnand %p2115_p7, %p2109_p4 }
  0x51   :  { %1697 = vmatprep.subr.bf16.mxu0 %v1785_v5  ;;  %v1803_v23 = vld [vmem:[#allocation2 + $0x18] sm:$0xff]   ;;  %v1804_v24 = vld [vmem:[#allocation5 + $0x20] sm:$0xff]   ;;  %v1806_v26 = vld [vmem:[#allocation5 + $0x28] sm:$0xff]  }
  0x52   :  { %v1805_v25 = vld [vmem:[#allocation2 + $0x20] sm:$0xff]   ;;  %v1807_v27 = vld [vmem:[#allocation2 + $0x28] sm:$0xff]   ;;  %v1808_v28 = vld [vmem:[#allocation5 + $0x30] sm:$0xff]  }
  0x53   :  { %1650 = vmatpush3.bf16.msra.mxu1 %v1784_v4  ;;  %v1809_v29 = vld [vmem:[#allocation2 + $0x30] sm:$0xff]   ;;  %v1810_v30 = vld [vmem:[#allocation5 + $0x38] sm:$0xff]   ;;  %v1812_v32 = vld [vmem:[#allocation5 + $0x40] sm:$0xff]  }
  0x54   :  { %1698 = vmatpush3.bf16.msra.mxu0 %v1785_v5  ;;  %1651 = vmatprep.subr.bf16.mxu1 %v1786_v6  ;;  %v1811_v31 = vld [vmem:[#allocation2 + $0x38] sm:$0xff]   ;;  %v1813_v33 = vld [vmem:[#allocation2 + $0x40] sm:$0xff]   ;;  %v1814_v34 = vld [vmem:[#allocation5 + $0x48] sm:$0xff]  }
  0x55   :  { %1699 = vmatprep.subr.bf16.mxu0 %v1787_v7  ;;  %v1815_v35 = vld [vmem:[#allocation2 + $0x48] sm:$0xff]   ;;  %v1816_v36 = vld [vmem:[#allocation5 + $0x50] sm:$0xff]   ;;  %v1818_v38 = vld [vmem:[#allocation5 + $0x58] sm:$0xff]  }
  0x56   :  { %v1817_v37 = vld [vmem:[#allocation2 + $0x50] sm:$0xff]   ;;  %v1819_v39 = vld [vmem:[#allocation2 + $0x58] sm:$0xff]   ;;  %v1820_v40 = vld [vmem:[#allocation5 + $0x60] sm:$0xff]  }
  0x57   :  { %1652 = vmatpush3.bf16.msra.mxu1 %v1786_v6  ;;  %v1821_v41 = vld [vmem:[#allocation2 + $0x60] sm:$0xff]   ;;  %v1822_v42 = vld [vmem:[#allocation5 + $0x68] sm:$0xff]   ;;  %v1824_v44 = vld [vmem:[#allocation5 + $0x70] sm:$0xff]  }
  0x58   :  { %1700 = vmatpush3.bf16.msra.mxu0 %v1787_v7  ;;  %1653 = vmatprep.subr.bf16.mxu1 %v1788_v8  ;;  %v1823_v43 = vld [vmem:[#allocation2 + $0x68] sm:$0xff]   ;;  %v1825_v45 = vld [vmem:[#allocation2 + $0x70] sm:$0xff]   ;;  %v1826_v46 = vld [vmem:[#allocation5 + $0x78] sm:$0xff]  }
  0x59   :  { %1701 = vmatprep.subr.bf16.mxu0 %v1789_v9  ;;  %v1827_v47 = vld [vmem:[#allocation2 + $0x78] sm:$0xff]   ;;  %v1567_v48 = vld [vmem:[#allocation7 + $0x8] sm:$0xff]   ;;  %v1424_v49 = vld [vmem:[#allocation7] sm:$0xff]  }
  0x5a   :  { %v1429_v50 = vunpack.c.l.bf16 %v1567_v48  ;;  %v1425_v51 = vunpack.c.l.bf16 %v1424_v49  ;;  %v1569_v52 = vld [vmem:[#allocation7 + $0x18] sm:$0xff]   ;;  %v1430_v53 = vunpack.c.h.bf16 %v1567_v48  ;;  %v1568_v54 = vld [vmem:[#allocation7 + $0x10] sm:$0xff]   ;;  %v1426_v55 = vunpack.c.h.bf16 %v1424_v49  ;;  %v1571_v58 = vld [vmem:[#allocation7 + $0x28] sm:$0xff]  }
  0x5b   :  { %1654 = vmatpush3.bf16.msra.mxu1 %v1788_v8  ;;  %v1437_v56 = vunpack.c.l.bf16 %v1569_v52  ;;  %v1433_v57 = vunpack.c.l.bf16 %v1568_v54  ;;  %v1438_v59 = vunpack.c.h.bf16 %v1569_v52  ;;  %v1570_v60 = vld [vmem:[#allocation7 + $0x20] sm:$0xff]   ;;  %v1434_v61 = vunpack.c.h.bf16 %v1568_v54  ;;  %v1573_v0 = vld [vmem:[#allocation7 + $0x38] sm:$0xff]   ;;  %v1572_v2 = vld [vmem:[#allocation7 + $0x30] sm:$0xff]  }
  0x5c   :  { %1702 = vmatpush3.bf16.msra.mxu0 %v1789_v9  ;;  %1655 = vmatprep.subr.bf16.mxu1 %v1790_v10  ;;  %1828 = vtanh.f32 %v1429_v50  ;;  %v1445_v62 = vunpack.c.l.bf16 %v1571_v58  ;;  %v1441_v63 = vunpack.c.l.bf16 %v1570_v60  ;;  %v1446_v1 = vunpack.c.h.bf16 %v1571_v58  ;;  %v1575_v6 = vld [vmem:[#allocation7 + $0x48] sm:$0xff]   ;;  %v1574_v9 = vld [vmem:[#allocation7 + $0x40] sm:$0xff]  }
  0x5d   :  { %1703 = vmatprep.subr.bf16.mxu0 %v1791_v11  ;;  %1830 = vtanh.f32 %v1425_v51  ;;  %v1442_v3 = vunpack.c.h.bf16 %v1570_v60  ;;  %v1453_v4 = vunpack.c.l.bf16 %v1573_v0  ;;  %v1449_v5 = vunpack.c.l.bf16 %v1572_v2 }
  0x5e   :  { %1832 = vtanh.f32 %v1430_v53  ;;  %v1454_v8 = vunpack.c.h.bf16 %v1573_v0  ;;  %v1461_v13 = vunpack.c.l.bf16 %v1575_v6 }
  0x5f   :  { %1656 = vmatpush3.bf16.msra.mxu1 %v1790_v10  ;;  %1834 = vtanh.f32 %v1426_v55 }
  0x60   :  { %1704 = vmatpush3.bf16.msra.mxu0 %v1791_v11  ;;  %1657 = vmatprep.subr.bf16.mxu1 %v1792_v14  ;;  %1836 = vtanh.f32 %v1437_v56  ;;  %v1450_v11 = vunpack.c.h.bf16 %v1572_v2 }
  0x61   :  { %1705 = vmatprep.subr.bf16.mxu0 %v1793_v15  ;;  %1838 = vtanh.f32 %v1433_v57 }
  0x62   :  { %1840 = vtanh.f32 %v1438_v59 }
  0x63   :  { %1658 = vmatpush3.bf16.msra.mxu1 %v1792_v14  ;;  %1842 = vtanh.f32 %v1434_v61  ;;  %v2276_v61 = vld [vmem:[#allocation7 + $0x68] sm:$0xff]  }
  0x64   :  { %1706 = vmatpush3.bf16.msra.mxu0 %v1793_v15  ;;  %1659 = vmatprep.subr.bf16.mxu1 %v1794_v16  ;;  %1844 = vtanh.f32 %v1445_v62  ;;  %v1457_v15 = vunpack.c.l.bf16 %v1574_v9 }
  0x65   :  { %1707 = vmatprep.subr.bf16.mxu0 %v1795_v17  ;;  %1846 = vtanh.f32 %v1441_v63 }
  0x66   :  { %v2244_v7 = vpop.eup %1828  ;;  %1848 = vtanh.f32 %v1446_v1 }
  0x67   :  { %1660 = vmatpush3.bf16.msra.mxu1 %v1794_v16  ;;  %v2246_v10 = vpop.eup %1830  ;;  %1850 = vtanh.f32 %v1442_v3 }
  0x68   :  { %1708 = vmatpush3.bf16.msra.mxu0 %v1795_v17  ;;  %v2248_v12 = vpop.eup %1832  ;;  %1852 = vtanh.f32 %v1453_v4 }
  0x69   :  { %v2250_v14 = vpop.eup %1834  ;;  %1854 = vtanh.f32 %v1449_v5 }
  0x6a   :  { %1662 = vmatmul.mubr.bf16.vlgmr.msra.gmra.mrb[0].mxu1 %v1798_v18  ;;  %v2252_v16 = vpop.eup %1836  ;;  %1856 = vtanh.f32 %v1454_v8  ;;  %v1462_v18 = vunpack.c.h.bf16 %v1575_v6  ;;  %v1477_v8 = vunpack.c.l.bf16 %v2276_v61 }
  0x6b   :  { %1710 = vmatmul.mubr.bf16.vlgmr.msra.gmra.mrb[0].mxu0 %v1799_v19  ;;  %1665 = vmatprep.mubr.bf16.mxu1 %v1800_v20  ;;  %v2254_v19 = vpop.eup %1838  ;;  %1858 = vtanh.f32 %v1450_v11 }
  0x6c   :  { %1713 = vmatprep.mubr.bf16.mxu0 %v1801_v21  ;;  %1860 = vtanh.f32 %v1461_v13 }
  0x6d   :  { %1862 = vtanh.f32 %v1457_v15 }
  0x6e   :  { %1864 = vtanh.f32 %v1462_v18 }
  0x72   :  { %1666 = vmatmul.mubr.bf16.gmra.mrb[4].mxu1 %v1802_v22  ;;  %v1458_v22 = vunpack.c.h.bf16 %v1574_v9 }
  0x73   :  { %1714 = vmatmul.mubr.bf16.gmra.mrb[4].mxu0 %v1803_v23  ;;  %1669 = vmatprep.mubr.bf16.mxu1 %v1804_v24  ;;  %v2256_v23 = vpop.eup %1840 }
  0x74   :  { %1717 = vmatprep.mubr.bf16.mxu0 %v1805_v25  ;;  %1866 = vtanh.f32 %v1458_v22 }
  0x7a   :  { %1670 = vmatmul.mubr.bf16.gmra.mrb[8].mxu1 %v1806_v26 }
  0x7b   :  { %1718 = vmatmul.mubr.bf16.gmra.mrb[8].mxu0 %v1807_v27  ;;  %1673 = vmatprep.mubr.bf16.mxu1 %v1808_v28  ;;  %v2258_v27 = vpop.eup %1842 }
  0x7c   :  { %1721 = vmatprep.mubr.bf16.mxu0 %v1809_v29 }
  0x82   :  { %1674 = vmatmul.mubr.bf16.gmra.mrb[12].mxu1 %v1810_v30 }
  0x83   :  { %1722 = vmatmul.mubr.bf16.gmra.mrb[12].mxu0 %v1811_v31  ;;  %1677 = vmatprep.mubr.bf16.mxu1 %v1812_v32  ;;  %v1577_v31 = vld [vmem:[#allocation7 + $0x58] sm:$0xff]   ;;  %v2260_v32 = vpop.eup %1844 }
  0x84   :  { %1725 = vmatprep.mubr.bf16.mxu0 %v1813_v33  ;;  %v1470_v48 = vunpack.c.h.bf16 %v1577_v31 }
  0x8a   :  { %1678 = vmatmul.mubr.bf16.gmra.mrb[16].mxu1 %v1814_v34 }
  0x8b   :  { %1726 = vmatmul.mubr.bf16.gmra.mrb[16].mxu0 %v1815_v35  ;;  %1681 = vmatprep.mubr.bf16.mxu1 %v1816_v36  ;;  %v1576_v36 = vld [vmem:[#allocation7 + $0x50] sm:$0xff]  }
  0x8c   :  { %1729 = vmatprep.mubr.bf16.mxu0 %v1817_v37  ;;  %v2262_v37 = vpop.eup %1846  ;;  %v1466_v52 = vunpack.c.h.bf16 %v1576_v36 }
  0x92   :  { %1682 = vmatmul.mubr.bf16.gmra.mrb[20].mxu1 %v1818_v38 }
  0x93   :  { %1730 = vmatmul.mubr.bf16.gmra.mrb[20].mxu0 %v1819_v39  ;;  %1685 = vmatprep.mubr.bf16.mxu1 %v1820_v40  ;;  %v2264_v40 = vpop.eup %1848 }
  0x94   :  { %1733 = vmatprep.mubr.bf16.mxu0 %v1821_v41 }
  0x9a   :  { %1686 = vmatmul.mubr.bf16.gmra.mrb[24].mxu1 %v1822_v42  ;;  %v1469_v42 = vunpack.c.l.bf16 %v1577_v31 }
  0x9b   :  { %1734 = vmatmul.mubr.bf16.gmra.mrb[24].mxu0 %v1823_v43  ;;  %1689 = vmatprep.mubr.bf16.mxu1 %v1824_v44  ;;  %v2266_v43 = vpop.eup %1850 }
  0x9c   :  { %1737 = vmatprep.mubr.bf16.mxu0 %v1825_v45  ;;  %v1465_v45 = vunpack.c.l.bf16 %v1576_v36 }
  0xa2   :  { %1690 = vmatmul.mubr.bf16.gmra.mrb[28].mxu1 %v1826_v46  ;;  %v2268_v46 = vpop.eup %1852 }
  0xa3   :  { %1738 = vmatmul.mubr.bf16.gmra.mrb[28].mxu0 %v1827_v47  ;;  %v2270_v49 = vpop.eup %1854 }
  0xa4   :  { %v2272_v53 = vpop.eup %1856 }
  0xa5   :  { %v2274_v57 = vpop.eup %1858 }
  0xa6   :  { %v2278_v62 = vpop.eup %1860 }
  0xa7   :  { %v2280_v2 = vpop.eup %1862 }
  0xa8   :  { %v2282_v5 = vpop.eup %1864 }
  0xa9   :  { %v2285_v9 = vpop.eup %1866 }
 0x13d   :  { %v1663_v17 = vpop.f32.mrb[0].mxu1 }
 0x13e   :  { %v1711_v20 = vpop.f32.mrb[0].mxu0  ;;  %v348_v21 = vpop.f32.mrb[1].mxu1 }
 0x13f   :  { %v662_v24 = vadd.f32 %v1711_v20, %v1663_v17  ;;  %v653_v25 = vpop.f32.mrb[1].mxu0  ;;  %v1664_v26 = vpop.f32.mrb[2].mxu1 }
 0x140   :  { %v654_v28 = vadd.f32 %v653_v25, %v348_v21  ;;  %v1712_v29 = vpop.f32.mrb[2].mxu0  ;;  %v351_v30 = vpop.f32.mrb[3].mxu1 }
 0x141   :  { %v1329_v33 = vmul.f32 -1.442695, %v662_v24  ;;  %v665_v34 = vadd.f32 %v1712_v29, %v1664_v26  ;;  %v656_v35 = vpop.f32.mrb[3].mxu0 }
 0x142   :  { %v1327_v38 = vmul.f32 -1.442695, %v654_v28  ;;  %v657_v39 = vadd.f32 %v656_v35, %v351_v30 }
 0x143   :  { %1868 = vpow2.f32 %v1329_v33  ;;  %v1330_v41 = vmul.f32 -1.442695, %v665_v34 }
 0x144   :  { %1870 = vpow2.f32 %v1327_v38  ;;  %v1328_v44 = vmul.f32 -1.442695, %v657_v39 }
 0x145   :  { %1872 = vpow2.f32 %v1330_v41  ;;  %v1667_v47 = vpop.f32.mrb[4].mxu1 }
 0x146   :  { %1874 = vpow2.f32 %v1328_v44  ;;  %v1715_v50 = vpop.f32.mrb[4].mxu0  ;;  %v364_v51 = vpop.f32.mrb[5].mxu1 }
 0x147   :  { %v678_v54 = vadd.f32 %v1715_v50, %v1667_v47  ;;  %v669_v55 = vpop.f32.mrb[5].mxu0  ;;  %v1668_v56 = vpop.f32.mrb[6].mxu1  ;;  %1876 = vtanh.f32 %v1469_v42 }
 0x148   :  { %v670_v58 = vadd.f32 %v669_v55, %v364_v51  ;;  %v1716_v59 = vpop.f32.mrb[6].mxu0  ;;  %v367_v60 = vpop.f32.mrb[7].mxu1  ;;  %1878 = vtanh.f32 %v1465_v45 }
 0x149   :  { %v1333_v63 = vmul.f32 -1.442695, %v678_v54  ;;  %v681_v0 = vadd.f32 %v1716_v59, %v1668_v56  ;;  %v672_v1 = vpop.f32.mrb[7].mxu0  ;;  %1880 = vtanh.f32 %v1470_v48 }
 0x14a   :  { %v1331_v3 = vmul.f32 -1.442695, %v670_v58  ;;  %v673_v4 = vadd.f32 %v672_v1, %v367_v60  ;;  %1882 = vtanh.f32 %v1466_v52 }
 0x14b   :  { %1884 = vpow2.f32 %v1333_v63  ;;  %v1334_v6 = vmul.f32 -1.442695, %v681_v0 }
 0x14c   :  { %1886 = vpow2.f32 %v1331_v3  ;;  %v1332_v11 = vmul.f32 -1.442695, %v673_v4 }
 0x14d   :  { %v1869_v13 = vpop.eup %1868  ;;  %1888 = vpow2.f32 %v1334_v6  ;;  %v1671_v15 = vpop.f32.mrb[8].mxu1 }
 0x14e   :  { %v1871_v17 = vpop.eup %1870  ;;  %v878_v18 = vadd.f32 1.0, %v1869_v13  ;;  %1890 = vpow2.f32 %v1332_v11  ;;  %v1719_v20 = vpop.f32.mrb[8].mxu0 }
 0x14f   :  { %v380_v21 = vpop.f32.mrb[9].mxu1  ;;  %v1873_v22 = vpop.eup %1872  ;;  %v876_v24 = vadd.f32 1.0, %v1871_v17  ;;  %v694_v25 = vadd.f32 %v1719_v20, %v1671_v15  ;;  %1892 = vtanh.f32 %v1477_v8 }
 0x150   :  { %v685_v26 = vpop.f32.mrb[9].mxu0  ;;  %v1672_v28 = vpop.f32.mrb[10].mxu1  ;;  %1894 = vrcp.f32 %v878_v18  ;;  %v879_v30 = vadd.f32 1.0, %v1873_v22  ;;  %v2297_v22 = vld [vmem:[#allocation7 + $0x60] sm:$0xff]  }
 0x151   :  { %v1875_v29 = vpop.eup %1874  ;;  %v686_v31 = vadd.f32 %v685_v26, %v380_v21  ;;  %v1720_v33 = vpop.f32.mrb[10].mxu0  ;;  %1896 = vrcp.f32 %v876_v24  ;;  %v1337_v38 = vmul.f32 -1.442695, %v694_v25 }
 0x152   :  { %v383_v34 = vpop.f32.mrb[11].mxu1  ;;  %v2287_v35 = vpop.eup %1876  ;;  %v877_v36 = vadd.f32 1.0, %v1875_v29  ;;  %v697_v39 = vadd.f32 %v1720_v33, %v1672_v28  ;;  %1898 = vrcp.f32 %v879_v30  ;;  %v1473_v33 = vunpack.c.l.bf16 %v2297_v22 }
 0x153   :  { %v688_v41 = vpop.f32.mrb[11].mxu0  ;;  %v2289_v42 = vpop.eup %1878  ;;  %v1335_v44 = vmul.f32 -1.442695, %v686_v31 }
 0x154   :  { %v689_v45 = vadd.f32 %v688_v41, %v383_v34  ;;  %v2291_v47 = vpop.eup %1880  ;;  %1900 = vrcp.f32 %v877_v36  ;;  %v1338_v48 = vmul.f32 -1.442695, %v697_v39 }
 0x155   :  { %v2293_v50 = vpop.eup %1882  ;;  %1902 = vpow2.f32 %v1337_v38  ;;  %v1675_v54 = vpop.f32.mrb[12].mxu1 }
 0x156   :  { %v1336_v51 = vmul.f32 -1.442695, %v689_v45  ;;  %v1885_v52 = vpop.eup %1884  ;;  %1904 = vpow2.f32 %v1335_v44  ;;  %v1723_v58 = vpop.f32.mrb[12].mxu0 }
 0x157   :  { %v1887_v55 = vpop.eup %1886  ;;  %v882_v56 = vadd.f32 1.0, %v1885_v52  ;;  %1906 = vpow2.f32 %v1338_v48  ;;  %v396_v59 = vpop.f32.mrb[13].mxu1  ;;  %v710_v0 = vadd.f32 %v1723_v58, %v1675_v54 }
 0x158   :  { %v1889_v60 = vpop.eup %1888  ;;  %v880_v63 = vadd.f32 1.0, %v1887_v55  ;;  %1908 = vpow2.f32 %v1336_v51  ;;  %v701_v1 = vpop.f32.mrb[13].mxu0 }
 0x159   :  { %v1676_v3 = vpop.f32.mrb[14].mxu1  ;;  %v1891_v4 = vpop.eup %1890  ;;  %1910 = vrcp.f32 %v882_v56  ;;  %v883_v6 = vadd.f32 1.0, %v1889_v60  ;;  %v702_v8 = vadd.f32 %v701_v1, %v396_v59  ;;  %v1341_v18 = vmul.f32 -1.442695, %v710_v0 }
 0x15a   :  { %v1724_v11 = vpop.f32.mrb[14].mxu0  ;;  %v399_v13 = vpop.f32.mrb[15].mxu1  ;;  %1912 = vrcp.f32 %v880_v63  ;;  %v881_v17 = vadd.f32 1.0, %v1891_v4 }
 0x15b   :  { %v2295_v15 = vpop.eup %1892  ;;  %v713_v20 = vadd.f32 %v1724_v11, %v1676_v3  ;;  %v704_v21 = vpop.f32.mrb[15].mxu0  ;;  %1914 = vrcp.f32 %v883_v6  ;;  %v1339_v25 = vmul.f32 -1.442695, %v702_v8 }
 0x15c   :  { %v1895_v24 = vpop.eup %1894  ;;  %v705_v26 = vadd.f32 %v704_v21, %v399_v13  ;;  %1916 = vrcp.f32 %v881_v17 }
 0x15d   :  { %v1897_v28 = vpop.eup %1896  ;;  %v1342_v29 = vmul.f32 -1.442695, %v713_v20  ;;  %1918 = vpow2.f32 %v1341_v18  ;;  %v1070_v36 = vmul.f32 %v1895_v24, %v2244_v7  ;;  %v1679_v39 = vpop.f32.mrb[16].mxu1 }
 0x15e   :  { %v1899_v30 = vpop.eup %1898  ;;  %v1340_v31 = vmul.f32 -1.442695, %v705_v26  ;;  %1920 = vpow2.f32 %v1339_v25  ;;  %v1068_v44 = vmul.f32 %v1897_v28, %v2246_v10  ;;  %v1727_v48 = vpop.f32.mrb[16].mxu0 }
 0x15f   :  { %v1901_v34 = vpop.eup %1900  ;;  %v1071_v38 = vmul.f32 %v1899_v30, %v2248_v12  ;;  %1922 = vpow2.f32 %v1342_v29  ;;  %v412_v51 = vpop.f32.mrb[17].mxu1  ;;  %v726_v56 = vadd.f32 %v1727_v48, %v1679_v39 }
 0x160   :  { %v1903_v41 = vpop.eup %1902  ;;  %v1069_v45 = vmul.f32 %v1901_v34, %v2250_v14  ;;  %1924 = vpow2.f32 %v1340_v31  ;;  %v717_v58 = vpop.f32.mrb[17].mxu0 }
 0x161   :  { %v1905_v52 = vpop.eup %1904  ;;  %v1495_v54 = vpack.c.bf16 %v1071_v38, %v1070_v36  ;;  %v886_v55 = vadd.f32 1.0, %v1903_v41  ;;  %v1680_v59 = vpop.f32.mrb[18].mxu1  ;;  %v718_v63 = vadd.f32 %v717_v58, %v412_v51  ;;  %1926 = vtanh.f32 %v1473_v33 }
 0x162   :  { %v1907_v7 = vpop.eup %1906  ;;  %v1490_v60 = vpack.c.bf16 %v1069_v45, %v1068_v44  ;;  %v884_v12 = vadd.f32 1.0, %v1905_v52  ;;  %v1728_v0 = vpop.f32.mrb[18].mxu0  ;;  %v1345_v3 = vmul.f32 -1.442695, %v726_v56 }
 0x163   :  { %v415_v1 = vpop.f32.mrb[19].mxu1  ;;  %v1909_v10 = vpop.eup %1908  ;;  %1582 = vst [vmem:[#allocation10 + $0x8] sm:$0xff] %v1495_v54   ;;  %1928 = vrcp.f32 %v886_v55  ;;  %v887_v14 = vadd.f32 1.0, %v1907_v7  ;;  %v729_v4 = vadd.f32 %v1728_v0, %v1680_v59  ;;  %v1343_v13 = vmul.f32 -1.442695, %v718_v63 }
 0x164   :  { %v720_v6 = vpop.f32.mrb[19].mxu0  ;;  %v1911_v8 = vpop.eup %1910  ;;  %1491 = vst [vmem:[#allocation10] sm:$0xff] %v1490_v60   ;;  %1930 = vrcp.f32 %v884_v12  ;;  %v885_v11 = vadd.f32 1.0, %v1909_v10 }
 0x165   :  { %v721_v17 = vadd.f32 %v720_v6, %v415_v1  ;;  %v1913_v18 = vpop.eup %1912  ;;  %1932 = vrcp.f32 %v887_v14  ;;  %v1346_v20 = vmul.f32 -1.442695, %v729_v4  ;;  %v1074_v26 = vmul.f32 %v1911_v8, %v2252_v16  ;;  %v1683_v29 = vpop.f32.mrb[20].mxu1 }
 0x166   :  { %v1915_v21 = vpop.eup %1914  ;;  %1934 = vrcp.f32 %v885_v11  ;;  %v1072_v31 = vmul.f32 %v1913_v18, %v2254_v19  ;;  %v1731_v34 = vpop.f32.mrb[20].mxu0  ;;  %v1478_v6 = vunpack.c.h.bf16 %v2276_v61 }
 0x167   :  { %v1344_v24 = vmul.f32 -1.442695, %v721_v17  ;;  %v1917_v25 = vpop.eup %1916  ;;  %v1075_v28 = vmul.f32 %v1915_v21, %v2256_v23  ;;  %1936 = vpow2.f32 %v1345_v3  ;;  %v428_v36 = vpop.f32.mrb[21].mxu1  ;;  %v742_v44 = vadd.f32 %v1731_v34, %v1683_v29 }
 0x168   :  { %v1919_v30 = vpop.eup %1918  ;;  %v1073_v33 = vmul.f32 %v1917_v25, %v2258_v27  ;;  %1938 = vpow2.f32 %v1343_v13  ;;  %v733_v45 = vpop.f32.mrb[21].mxu0 }
 0x169   :  { %v1921_v38 = vpop.eup %1920  ;;  %v1505_v39 = vpack.c.bf16 %v1075_v28, %v1074_v26  ;;  %v890_v41 = vadd.f32 1.0, %v1919_v30  ;;  %1940 = vpow2.f32 %v1346_v20  ;;  %v1684_v48 = vpop.f32.mrb[22].mxu1  ;;  %v734_v52 = vadd.f32 %v733_v45, %v428_v36 }
 0x16a   :  { %v1923_v16 = vpop.eup %1922  ;;  %v1500_v51 = vpack.c.bf16 %v1073_v33, %v1072_v31  ;;  %v888_v23 = vadd.f32 1.0, %v1921_v38  ;;  %1942 = vpow2.f32 %v1344_v24  ;;  %v1732_v54 = vpop.f32.mrb[22].mxu0  ;;  %v1349_v56 = vmul.f32 -1.442695, %v742_v44 }
 0x16b   :  { %v431_v55 = vpop.f32.mrb[23].mxu1  ;;  %v1925_v19 = vpop.eup %1924  ;;  %1584 = vst [vmem:[#allocation10 + $0x18] sm:$0xff] %v1505_v39   ;;  %1944 = vrcp.f32 %v890_v41  ;;  %v891_v27 = vadd.f32 1.0, %v1923_v16  ;;  %v745_v58 = vadd.f32 %v1732_v54, %v1684_v48  ;;  %v1347_v12 = vmul.f32 -1.442695, %v734_v52 }
 0x16c   :  { %v736_v59 = vpop.f32.mrb[23].mxu0  ;;  %v2308_v7 = vpop.eup %1926  ;;  %1583 = vst [vmem:[#allocation10 + $0x10] sm:$0xff] %v1500_v51   ;;  %1946 = vrcp.f32 %v888_v23  ;;  %v889_v60 = vadd.f32 1.0, %v1925_v19 }
 0x16d   :  { %v737_v63 = vadd.f32 %v736_v59, %v431_v55  ;;  %v1929_v0 = vpop.eup %1928  ;;  %1948 = vrcp.f32 %v891_v27  ;;  %v1350_v1 = vmul.f32 -1.442695, %v745_v58  ;;  %v1687_v4 = vpop.f32.mrb[24].mxu1 }
 0x16e   :  { %v1931_v10 = vpop.eup %1930  ;;  %1950 = vrcp.f32 %v889_v60  ;;  %v1078_v11 = vmul.f32 %v1929_v0, %v2260_v32  ;;  %v1735_v17 = vpop.f32.mrb[24].mxu0 }
 0x16f   :  { %v1348_v14 = vmul.f32 -1.442695, %v737_v63  ;;  %v1933_v3 = vpop.eup %1932  ;;  %1952 = vpow2.f32 %v1349_v56  ;;  %v444_v18 = vpop.f32.mrb[25].mxu1  ;;  %v1076_v21 = vmul.f32 %v1931_v10, %v2262_v37  ;;  %v758_v25 = vadd.f32 %v1735_v17, %v1687_v4 }
 0x170   :  { %v1935_v8 = vpop.eup %1934  ;;  %v1079_v13 = vmul.f32 %v1933_v3, %v2264_v40  ;;  %1954 = vpow2.f32 %v1347_v12  ;;  %v749_v26 = vpop.f32.mrb[25].mxu0 }
 0x171   :  { %v1937_v20 = vpop.eup %1936  ;;  %v1077_v24 = vmul.f32 %v1935_v8, %v2266_v43  ;;  %1956 = vpow2.f32 %v1350_v1  ;;  %v1688_v28 = vpop.f32.mrb[26].mxu1  ;;  %v750_v31 = vadd.f32 %v749_v26, %v444_v18  ;;  %v1353_v41 = vmul.f32 -1.442695, %v758_v25 }
 0x172   :  { %v1939_v29 = vpop.eup %1938  ;;  %v1515_v30 = vpack.c.bf16 %v1079_v13, %v1078_v11  ;;  %v894_v61 = vadd.f32 1.0, %v1937_v20  ;;  %1958 = vpow2.f32 %v1348_v14  ;;  %v1736_v32 = vpop.f32.mrb[26].mxu0 }
 0x173   :  { %v447_v33 = vpop.f32.mrb[27].mxu1  ;;  %v1941_v40 = vpop.eup %1940  ;;  %v1510_v34 = vpack.c.bf16 %v1077_v24, %v1076_v21  ;;  %v892_v36 = vadd.f32 1.0, %v1939_v29  ;;  %v761_v38 = vadd.f32 %v1736_v32, %v1688_v28  ;;  %1960 = vtanh.f32 %v1478_v6 }
 0x174   :  { %v752_v39 = vpop.f32.mrb[27].mxu0  ;;  %v1943_v37 = vpop.eup %1942  ;;  %1586 = vst [vmem:[#allocation10 + $0x28] sm:$0xff] %v1515_v30   ;;  %1962 = vrcp.f32 %v894_v61  ;;  %v895_v43 = vadd.f32 1.0, %v1941_v40  ;;  %v1351_v16 = vmul.f32 -1.442695, %v750_v31  ;;  %v1474_v32 = vunpack.c.h.bf16 %v2297_v22 }
 0x175   :  { %v753_v44 = vadd.f32 %v752_v39, %v447_v33  ;;  %v1945_v45 = vpop.eup %1944  ;;  %1585 = vst [vmem:[#allocation10 + $0x20] sm:$0xff] %v1510_v34   ;;  %1964 = vrcp.f32 %v892_v36  ;;  %v893_v48 = vadd.f32 1.0, %v1943_v37  ;;  %v1354_v23 = vmul.f32 -1.442695, %v761_v38  ;;  %v1691_v55 = vpop.f32.mrb[28].mxu1  ;;  %v1581_v37 = vld [vmem:[#allocation7 + $0x78] sm:$0xff]  }
 0x176   :  { %v1947_v51 = vpop.eup %1946  ;;  %1966 = vrcp.f32 %v895_v43  ;;  %v1082_v27 = vmul.f32 %v1945_v45, %v2268_v46  ;;  %v1739_v58 = vpop.f32.mrb[28].mxu0  ;;  %v1580_v45 = vld [vmem:[#allocation7 + $0x70] sm:$0xff]  }
 0x177   :  { %v1949_v52 = vpop.eup %1948  ;;  %1968 = vrcp.f32 %v893_v48  ;;  %v1352_v54 = vmul.f32 -1.442695, %v753_v44  ;;  %v460_v59 = vpop.f32.mrb[29].mxu1  ;;  %v1080_v12 = vmul.f32 %v1947_v51, %v2270_v49  ;;  %v774_v0 = vadd.f32 %v1739_v58, %v1691_v55 }
 0x178   :  { %v1951_v19 = vpop.eup %1950  ;;  %v1083_v56 = vmul.f32 %v1949_v52, %v2272_v53  ;;  %1970 = vpow2.f32 %v1353_v41  ;;  %v765_v1 = vpop.f32.mrb[29].mxu0  ;;  %v1485_v51 = vunpack.c.l.bf16 %v1581_v37 }
 0x179   :  { %v1953_v60 = vpop.eup %1952  ;;  %v1081_v63 = vmul.f32 %v1951_v19, %v2274_v57  ;;  %1972 = vpow2.f32 %v1351_v16  ;;  %v1692_v10 = vpop.f32.mrb[30].mxu1  ;;  %v766_v6 = vadd.f32 %v765_v1, %v460_v59  ;;  %v1357_v57 = vmul.f32 -1.442695, %v774_v0 }
 0x17a   :  { %v1955_v14 = vpop.eup %1954  ;;  %v1525_v3 = vpack.c.bf16 %v1083_v56, %v1082_v27  ;;  %v898_v4 = vadd.f32 1.0, %v1953_v60  ;;  %1974 = vpow2.f32 %v1354_v23  ;;  %v1740_v46 = vpop.f32.mrb[30].mxu0  ;;  %v1482_v19 = vunpack.c.h.bf16 %v1580_v45 }
 0x17b   :  { %v463_v8 = vpop.f32.mrb[31].mxu1  ;;  %v1957_v53 = vpop.eup %1956  ;;  %v1520_v11 = vpack.c.bf16 %v1081_v63, %v1080_v12  ;;  %v896_v13 = vadd.f32 1.0, %v1955_v14  ;;  %1976 = vpow2.f32 %v1352_v54  ;;  %v777_v20 = vadd.f32 %v1740_v46, %v1692_v10 }
 0x17c   :  { %v768_v17 = vpop.f32.mrb[31].mxu0  ;;  %v1959_v18 = vpop.eup %1958  ;;  %1588 = vst [vmem:[#allocation10 + $0x38] sm:$0xff] %v1525_v3   ;;  %1978 = vrcp.f32 %v898_v4  ;;  %v899_v49 = vadd.f32 1.0, %v1957_v53  ;;  %v1355_v25 = vmul.f32 -1.442695, %v766_v6  ;;  %v1486_v54 = vunpack.c.h.bf16 %v1581_v37 }
 0x17d   :  { %v2319_v21 = vpop.eup %1960  ;;  %1587 = vst [vmem:[#allocation10 + $0x30] sm:$0xff] %v1520_v11   ;;  %1980 = vrcp.f32 %v896_v13  ;;  %v897_v24 = vadd.f32 1.0, %v1959_v18  ;;  %v769_v26 = vadd.f32 %v768_v17, %v463_v8  ;;  %v1358_v29 = vmul.f32 -1.442695, %v777_v20 }
 0x17e   :  { %v1963_v28 = vpop.eup %1962  ;;  %1982 = vrcp.f32 %v899_v49 }
 0x17f   :  { %v1965_v30 = vpop.eup %1964  ;;  %1984 = vrcp.f32 %v897_v24  ;;  %v1356_v61 = vmul.f32 -1.442695, %v769_v26  ;;  %v1086_v40 = vmul.f32 %v1963_v28, %v2278_v62 }
 0x180   :  { %v1967_v31 = vpop.eup %1966  ;;  %1986 = vpow2.f32 %v1357_v57  ;;  %v1084_v38 = vmul.f32 %v1965_v30, %v2280_v2 }
 0x181   :  { %v1969_v33 = vpop.eup %1968  ;;  %v1087_v34 = vmul.f32 %v1967_v31, %v2282_v5  ;;  %1988 = vpow2.f32 %v1355_v25 }
 0x182   :  { %v1971_v36 = vpop.eup %1970  ;;  %v1085_v39 = vmul.f32 %v1969_v33, %v2285_v9  ;;  %1990 = vpow2.f32 %v1358_v29  ;;  %v1481_v9 = vunpack.c.l.bf16 %v1580_v45 }
 0x183   :  { %v1973_v43 = vpop.eup %1972  ;;  %v1535_v41 = vpack.c.bf16 %v1087_v34, %v1086_v40  ;;  %v902_v44 = vadd.f32 1.0, %v1971_v36  ;;  %1992 = vpow2.f32 %v1356_v61 }
 0x184   :  { %v1975_v22 = vpop.eup %1974  ;;  %v1530_v48 = vpack.c.bf16 %v1085_v39, %v1084_v38  ;;  %v900_v16 = vadd.f32 1.0, %v1973_v43  ;;  %1994 = vtanh.f32 %v1474_v32 }
 0x185   :  { %v1977_v62 = vpop.eup %1976  ;;  %1590 = vst [vmem:[#allocation10 + $0x48] sm:$0xff] %v1535_v41   ;;  %1996 = vrcp.f32 %v902_v44  ;;  %v903_v5 = vadd.f32 1.0, %v1975_v22 }
 0x186   :  { %v1979_v23 = vpop.eup %1978  ;;  %1589 = vst [vmem:[#allocation10 + $0x40] sm:$0xff] %v1530_v48   ;;  %1998 = vrcp.f32 %v900_v16  ;;  %v901_v2 = vadd.f32 1.0, %v1977_v62 }
 0x187   :  { %v1981_v52 = vpop.eup %1980  ;;  %2000 = vrcp.f32 %v903_v5  ;;  %v1090_v56 = vmul.f32 %v1979_v23, %v2287_v35 }
 0x188   :  { %v1983_v55 = vpop.eup %1982  ;;  %2002 = vrcp.f32 %v901_v2  ;;  %v1088_v60 = vmul.f32 %v1981_v52, %v2289_v42 }
 0x189   :  { %v1985_v27 = vpop.eup %1984  ;;  %v1091_v58 = vmul.f32 %v1983_v55, %v2291_v47  ;;  %2004 = vtanh.f32 %v1485_v51 }
 0x18a   :  { %v1987_v59 = vpop.eup %1986  ;;  %v1089_v12 = vmul.f32 %v1985_v27, %v2293_v50  ;;  %2006 = vtanh.f32 %v1481_v9 }
 0x18b   :  { %v1989_v63 = vpop.eup %1988  ;;  %v1545_v0 = vpack.c.bf16 %v1091_v58, %v1090_v56  ;;  %v906_v1 = vadd.f32 1.0, %v1987_v59  ;;  %2008 = vtanh.f32 %v1486_v54 }
 0x18c   :  { %v1991_v10 = vpop.eup %1990  ;;  %v1540_v14 = vpack.c.bf16 %v1089_v12, %v1088_v60  ;;  %v904_v3 = vadd.f32 1.0, %v1989_v63  ;;  %2010 = vtanh.f32 %v1482_v19 }
 0x18d   :  { %v1993_v4 = vpop.eup %1992  ;;  %1592 = vst [vmem:[#allocation10 + $0x58] sm:$0xff] %v1545_v0   ;;  %2012 = vrcp.f32 %v906_v1  ;;  %v907_v35 = vadd.f32 1.0, %v1991_v10 }
 0x18e   :  { %v1995_v47 = vpop.eup %1994  ;;  %1591 = vst [vmem:[#allocation10 + $0x50] sm:$0xff] %v1540_v14   ;;  %2014 = vrcp.f32 %v904_v3  ;;  %v905_v6 = vadd.f32 1.0, %v1993_v4 }
 0x18f   :  { %v1997_v42 = vpop.eup %1996  ;;  %2016 = vrcp.f32 %v907_v35 }
 0x190   :  { %v1999_v50 = vpop.eup %1998  ;;  %2018 = vrcp.f32 %v905_v6  ;;  %v1094_v53 = vmul.f32 %v1997_v42, %v2295_v15 }
 0x191   :  { %v2001_v46 = vpop.eup %2000  ;;  %v1092_v17 = vmul.f32 %v1999_v50, %v2308_v7 }
 0x192   :  { %v2003_v8 = vpop.eup %2002  ;;  %v1095_v11 = vmul.f32 %v2001_v46, %v2319_v21 }
 0x193   :  { %v2005_v13 = vpop.eup %2004  ;;  %v1093_v18 = vmul.f32 %v2003_v8, %v1995_v47 }
 0x194   :  { %v2007_v49 = vpop.eup %2006  ;;  %v1555_v57 = vpack.c.bf16 %v1095_v11, %v1094_v53 }
 0x195   :  { %v2009_v20 = vpop.eup %2008  ;;  %v1550_v24 = vpack.c.bf16 %v1093_v18, %v1092_v17 }
 0x196   :  { %v2011_v25 = vpop.eup %2010  ;;  %1594 = vst [vmem:[#allocation10 + $0x68] sm:$0xff] %v1555_v57  }
 0x197   :  { %v2013_v26 = vpop.eup %2012  ;;  %1593 = vst [vmem:[#allocation10 + $0x60] sm:$0xff] %v1550_v24  }
 0x198   :  { %v2015_v28 = vpop.eup %2014  ;;  %v1098_v61 = vmul.f32 %v2013_v26, %v2005_v13 }
 0x199   :  { %v2017_v29 = vpop.eup %2016  ;;  %v1096_v15 = vmul.f32 %v2015_v28, %v2007_v49 }
 0x19a   :  { %v2019_v30 = vpop.eup %2018  ;;  %v1099_v31 = vmul.f32 %v2017_v29, %v2009_v20 }
 0x19b   :  { %v1097_v21 = vmul.f32 %v2019_v30, %v2011_v25 }
 0x19c   :  { %v1565_v32 = vpack.c.bf16 %v1099_v31, %v1098_v61 }
 0x19d   :  { %v1560_v7 = vpack.c.bf16 %v1097_v21, %v1096_v15 }
 0x19e   :  { %1596 = vst [vmem:[#allocation10 + $0x78] sm:$0xff] %v1565_v32  }
 0x19f   :  { %1595 = vst [vmem:[#allocation10 + $0x70] sm:$0xff] %v1560_v7  }
 0x1a0   :  { %2119 = shalt.err (!%p2116_p8)
}
 0x1a1   :  { %s2120_s15 = scalar_lea.hbm %s2352_s4, 2048 }
 0x1a2   :  { %p2121_p9 = scmp.ne.s32.totalorder %s2352_s4, %s2120_s15  ;;  %p2124_p10 = scmp.lt.u32.totalorder %s2120_s15, %s2352_s4 }
 0x1a4   :  { %p2126_p11 = pnand %p2124_p10, %p2121_p9 }
 0x1a6   :  { %2129 = shalt.err (!%p2126_p11)
}
 0x1a7   :  { %1271 = dma.vmem_to_hbm [thread:$0]  %s1266_s12, 2048, %s2352_s4, [#allocation4], %s2140_s27, %s2140_s27, %s2141_s28  }
 0x1a8   :  { %2136 = dma.done.wait [#allocation4], 2048  }
 0x1a9   :  { %2137 = vsyncadd [#allocation4], 4294965248 }
 0x1aa   :  { %1275 = vsyncpa [#allocation3], 1 }
 0x1ab   :  { %1276 = vsyncpa [#allocation6], 1 }
 0x1ac   :  { %1277 = vsyncpa [#allocation9], 1 }
 0x1ad   :  { %1278 = vsyncpa [#allocation4], 1 }

// kernel: tpu_custom_call.1
= control target key start
LH: loop header
LB: loop body
LE: loop exit
PB: predicated region body
PF: predicated region fallthrough
CT: control target
= control target key end

     0   :  { %9 = vsyncpa [#allocation3], 0  ;;  %s2348_s0 = inlined_call_operand.hbm [shape: bf16[256,128], index: 0, kind: input, shape index: {}]   ;;  %s2349_s1 = inlined_call_operand.hbm [shape: bf16[256,128], index: 1, kind: input, shape index: {}]   ;;  %s2350_s2 = inlined_call_operand.hbm [shape: bf16[256,128], index: 2, kind: input, shape index: {}]   ;;  %s2351_s3 = inlined_call_operand.hbm [shape: bf16[256,128], index: 3, kind: input, shape index: {}]   ;;  %s2352_s4 = inlined_call_operand.hbm [shape: bf16[256,128], index: 4, kind: output, shape index: {}]  }
   0x1   :  { %10 = vsyncpa [#allocation6], 0 }
   0x2   :  { %11 = vsyncpa [#allocation9], 0 }
   0x3   :  { %12 = vsyncpa [#allocation4], 0  ;;  %s2138_s15 = smov [#allocation5]   ;;  %s2139_s17 = smov [#allocation2]  }
   0x4   :  { %s30_s16 = sshll.u32 %s2138_s15, 4  ;;  %s18_s18 = sshll.u32 %s2139_s17, 4  ;;  %s31_s16 = int_to_ptr.vmem [resolvable:$true] %s30_s16  ;;  %s2170_s18 = int_to_ptr.vmem [resolvable:$true] %s18_s18 }
   0x5   :  { %s2020_s21 = scalar_lea.hbm %s2349_s1, 2048 }
   0x6   :  { %p2021_p0 = scmp.ne.s32.totalorder %s2349_s1, %s2020_s21  ;;  %p2024_p1 = scmp.lt.u32.totalorder %s2020_s21, %s2349_s1 }
   0x8   :  { %p2026_p2 = pnand %p2024_p1, %p2021_p0 }
   0xa   :  { %2029 = shalt.err (!%p2026_p2)
}
   0xb   :  { %s2030_s26 = scalar_lea.vmem %s31_s16, 2048  ;;  %p2035_p4 = scmp.lt.s32.totalorder %s31_s16, %s31_s16 }
   0xc   :  { %p2031_p3 = scmp.ne.s32.totalorder %s31_s16, %s2030_s26  ;;  %p2036_p5 = scmp.lt.s32.totalorder %s2030_s26, %s2030_s26 }
   0xe   :  { %p2037_p6 = por %p2036_p5, %p2035_p4 }
  0x10   :  { %p2038_p7 = pnand %p2037_p6, %p2031_p3 }
  0x12   :  { %2041 = shalt.err (!%p2038_p7)
}
  0x13   :  { %s2140_s27 = smov 64   ;;  %s2141_s28 = smov 4  }
  0x14   :  { %36 = dma.hbm_to_vmem [thread:$0]  %s2349_s1, 2048, %s31_s16, [#allocation6], %s2140_s27, %s2140_s27, %s2141_s28  }
  0x15   :  { %s2042_s7 = scalar_lea.hbm %s2348_s0, 2048 }
  0x16   :  { %p2043_p8 = scmp.ne.s32.totalorder %s2348_s0, %s2042_s7  ;;  %p2046_p9 = scmp.lt.u32.totalorder %s2042_s7, %s2348_s0 }
  0x18   :  { %p2048_p10 = pnand %p2046_p9, %p2043_p8 }
  0x1a   :  { %2051 = shalt.err (!%p2048_p10)
}
  0x1b   :  { %s2052_s12 = scalar_lea.vmem %s2170_s18, 2048  ;;  %p2057_p12 = scmp.lt.s32.totalorder %s2170_s18, %s2170_s18 }
  0x1c   :  { %p2053_p11 = scmp.ne.s32.totalorder %s2170_s18, %s2052_s12  ;;  %p2058_p13 = scmp.lt.s32.totalorder %s2052_s12, %s2052_s12 }
  0x1e   :  { %p2059_p0 = por %p2058_p13, %p2057_p12 }
  0x20   :  { %p2060_p1 = pnand %p2059_p0, %p2053_p11 }
  0x22   :  { %2063 = shalt.err (!%p2060_p1)
}
  0x23   :  { %24 = dma.hbm_to_vmem [thread:$0]  %s2348_s0, 2048, %s2170_s18, [#allocation3], %s2140_s27, %s2140_s27, %s2141_s28  }
  0x24   :  { %s2142_s14 = smov [#allocation7]   ;;  %s2143_s16 = smov [#allocation8]  }
  0x25   :  { %s42_s15 = sshll.u32 %s2142_s14, 4  ;;  %s54_s17 = sshll.u32 %s2143_s16, 4  ;;  %s43_s15 = int_to_ptr.vmem [resolvable:$true] %s42_s15  ;;  %s2207_s17 = int_to_ptr.vmem [resolvable:$true] %s54_s17 }
  0x26   :  { %s2064_s21 = scalar_lea.hbm %s2350_s2, 2048 }
  0x27   :  { %p2065_p2 = scmp.ne.s32.totalorder %s2350_s2, %s2064_s21  ;;  %p2068_p3 = scmp.lt.u32.totalorder %s2064_s21, %s2350_s2 }
  0x29   :  { %p2070_p4 = pnand %p2068_p3, %p2065_p2 }
  0x2b   :  { %2073 = shalt.err (!%p2070_p4)
}
  0x2c   :  { %s2074_s0 = scalar_lea.vmem %s43_s15, 2048  ;;  %p2079_p6 = scmp.lt.s32.totalorder %s43_s15, %s43_s15 }
  0x2d   :  { %p2075_p5 = scmp.ne.s32.totalorder %s43_s15, %s2074_s0  ;;  %p2080_p7 = scmp.lt.s32.totalorder %s2074_s0, %s2074_s0 }
  0x2f   :  { %p2081_p8 = por %p2080_p7, %p2079_p6 }
  0x31   :  { %p2082_p9 = pnand %p2081_p8, %p2075_p5 }
  0x33   :  { %2085 = shalt.err (!%p2082_p9)
}
  0x34   :  { %48 = dma.hbm_to_vmem [thread:$0]  %s2350_s2, 2048, %s43_s15, [#allocation6], %s2140_s27, %s2140_s27, %s2141_s28  }
  0x35   :  { %s2086_s5 = scalar_lea.hbm %s2351_s3, 2048 }
  0x36   :  { %p2087_p10 = scmp.ne.s32.totalorder %s2351_s3, %s2086_s5  ;;  %p2090_p11 = scmp.lt.u32.totalorder %s2086_s5, %s2351_s3 }
  0x38   :  { %p2092_p12 = pnand %p2090_p11, %p2087_p10 }
  0x3a   :  { %2095 = shalt.err (!%p2092_p12)
}
  0x3b   :  { %s2096_s10 = scalar_lea.vmem %s2207_s17, 2048  ;;  %p2101_p0 = scmp.lt.s32.totalorder %s2207_s17, %s2207_s17 }
  0x3c   :  { %p2097_p13 = scmp.ne.s32.totalorder %s2207_s17, %s2096_s10  ;;  %p2102_p1 = scmp.lt.s32.totalorder %s2096_s10, %s2096_s10 }
  0x3e   :  { %p2103_p2 = por %p2102_p1, %p2101_p0 }
  0x40   :  { %p2104_p3 = pnand %p2103_p2, %p2097_p13 }
  0x42   :  { %2107 = shalt.err (!%p2104_p3)
}
  0x43   :  { %60 = dma.hbm_to_vmem [thread:$0]  %s2351_s3, 2048, %s2207_s17, [#allocation9], %s2140_s27, %s2140_s27, %s2141_s28  }
  0x44   :  { %2130 = dma.done.wait [#allocation3], 2048  }
  0x45   :  { %2131 = vsyncadd [#allocation3], 4294965248 }
  0x46   :  { %2132 = dma.done.wait [#allocation6], 4096  }
  0x47   :  { %2133 = vsyncadd [#allocation6], 4294963200 }
  0x48   :  { %2134 = dma.done.wait [#allocation9], 2048  }
  0x49   :  { %2135 = vsyncadd [#allocation9], 4294965248  ;;  %v1780_v0 = vld [vmem:[#allocation8 + $0x40] sm:$0xff]   ;;  %v1782_v2 = vld [vmem:[#allocation8 + $0x48] sm:$0xff]   ;;  %s2144_s3 = smov [#allocation10]  }
  0x4a   :  { %v1781_v1 = vld [vmem:[#allocation8] sm:$0xff]   ;;  %1645 = vmatprep.subr.bf16.mxu1 %v1780_v0  ;;  %v1783_v3 = vld [vmem:[#allocation8 + $0x8] sm:$0xff]   ;;  %v1784_v4 = vld [vmem:[#allocation8 + $0x50] sm:$0xff]   ;;  %s1265_s12 = sshll.u32 %s2144_s3, 4  ;;  %s1266_s12 = int_to_ptr.vmem [resolvable:$true] %s1265_s12 }
  0x4b   :  { %1693 = vmatprep.subr.bf16.mxu0 %v1781_v1  ;;  %1646 = vmatpush3.bf16.msra.mxu1 %v1780_v0  ;;  %v1785_v5 = vld [vmem:[#allocation8 + $0x10] sm:$0xff]   ;;  %v1786_v6 = vld [vmem:[#allocation8 + $0x58] sm:$0xff]   ;;  %v1788_v8 = vld [vmem:[#allocation8 + $0x60] sm:$0xff]   ;;  %s2108_s1 = scalar_lea.vmem %s1266_s12, 2048  ;;  %p2113_p5 = scmp.lt.s32.totalorder %s1266_s12, %s1266_s12 }
  0x4c   :  { %1694 = vmatpush3.bf16.msra.mxu0 %v1781_v1  ;;  %1647 = vmatprep.subr.bf16.mxu1 %v1782_v2  ;;  %v1787_v7 = vld [vmem:[#allocation8 + $0x18] sm:$0xff]   ;;  %v1789_v9 = vld [vmem:[#allocation8 + $0x20] sm:$0xff]   ;;  %v1790_v10 = vld [vmem:[#allocation8 + $0x68] sm:$0xff]   ;;  %p2109_p4 = scmp.ne.s32.totalorder %s1266_s12, %s2108_s1  ;;  %p2114_p6 = scmp.lt.s32.totalorder %s2108_s1, %s2108_s1 }
  0x4d   :  { %1695 = vmatprep.subr.bf16.mxu0 %v1783_v3  ;;  %v1791_v11 = vld [vmem:[#allocation8 + $0x28] sm:$0xff]   ;;  %v1796_v12 = vld [vmem:[#allocation5] sm:$0xff]   ;;  %v1792_v14 = vld [vmem:[#allocation8 + $0x70] sm:$0xff]  }
  0x4e   :  { %v1797_v13 = vld [vmem:[#allocation2] sm:$0xff]   ;;  %1661 = vmatprep.mubr.bf16.mxu1 %v1796_v12  ;;  %v1793_v15 = vld [vmem:[#allocation8 + $0x30] sm:$0xff]   ;;  %v1794_v16 = vld [vmem:[#allocation8 + $0x78] sm:$0xff]   ;;  %p2115_p7 = por %p2114_p6, %p2113_p5 }
  0x4f   :  { %1648 = vmatpush3.bf16.msra.mxu1 %v1782_v2  ;;  %1709 = vmatprep.mubr.bf16.mxu0 %v1797_v13  ;;  %v1795_v17 = vld [vmem:[#allocation8 + $0x38] sm:$0xff]   ;;  %v1798_v18 = vld [vmem:[#allocation5 + $0x8] sm:$0xff]   ;;  %v1800_v20 = vld [vmem:[#allocation5 + $0x10] sm:$0xff]  }
  0x50   :  { %1696 = vmatpush3.bf16.msra.mxu0 %v1783_v3  ;;  %1649 = vmatprep.subr.bf16.mxu1 %v1784_v4  ;;  %v1799_v19 = vld [vmem:[#allocation2 + $0x8] sm:$0xff]   ;;  %v1801_v21 = vld [vmem:[#allocation2 + $0x10] sm:$0xff]   ;;  %v1802_v22 = vld [vmem:[#allocation5 + $0x18] sm:$0xff]   ;;  %p2116_p8 = pnand %p2115_p7, %p2109_p4 }
  0x51   :  { %1697 = vmatprep.subr.bf16.mxu0 %v1785_v5  ;;  %v1803_v23 = vld [vmem:[#allocation2 + $0x18] sm:$0xff]   ;;  %v1804_v24 = vld [vmem:[#allocation5 + $0x20] sm:$0xff]   ;;  %v1806_v26 = vld [vmem:[#allocation5 + $0x28] sm:$0xff]  }
  0x52   :  { %v1805_v25 = vld [vmem:[#allocation2 + $0x20] sm:$0xff]   ;;  %v1807_v27 = vld [vmem:[#allocation2 + $0x28] sm:$0xff]   ;;  %v1808_v28 = vld [vmem:[#allocation5 + $0x30] sm:$0xff]  }
  0x53   :  { %1650 = vmatpush3.bf16.msra.mxu1 %v1784_v4  ;;  %v1809_v29 = vld [vmem:[#allocation2 + $0x30] sm:$0xff]   ;;  %v1810_v30 = vld [vmem:[#allocation5 + $0x38] sm:$0xff]   ;;  %v1812_v32 = vld [vmem:[#allocation5 + $0x40] sm:$0xff]  }
  0x54   :  { %1698 = vmatpush3.bf16.msra.mxu0 %v1785_v5  ;;  %1651 = vmatprep.subr.bf16.mxu1 %v1786_v6  ;;  %v1811_v31 = vld [vmem:[#allocation2 + $0x38] sm:$0xff]   ;;  %v1813_v33 = vld [vmem:[#allocation2 + $0x40] sm:$0xff]   ;;  %v1814_v34 = vld [vmem:[#allocation5 + $0x48] sm:$0xff]  }
  0x55   :  { %1699 = vmatprep.subr.bf16.mxu0 %v1787_v7  ;;  %v1815_v35 = vld [vmem:[#allocation2 + $0x48] sm:$0xff]   ;;  %v1816_v36 = vld [vmem:[#allocation5 + $0x50] sm:$0xff]   ;;  %v1818_v38 = vld [vmem:[#allocation5 + $0x58] sm:$0xff]  }
  0x56   :  { %v1817_v37 = vld [vmem:[#allocation2 + $0x50] sm:$0xff]   ;;  %v1819_v39 = vld [vmem:[#allocation2 + $0x58] sm:$0xff]   ;;  %v1820_v40 = vld [vmem:[#allocation5 + $0x60] sm:$0xff]  }
  0x57   :  { %1652 = vmatpush3.bf16.msra.mxu1 %v1786_v6  ;;  %v1821_v41 = vld [vmem:[#allocation2 + $0x60] sm:$0xff]   ;;  %v1822_v42 = vld [vmem:[#allocation5 + $0x68] sm:$0xff]   ;;  %v1824_v44 = vld [vmem:[#allocation5 + $0x70] sm:$0xff]  }
  0x58   :  { %1700 = vmatpush3.bf16.msra.mxu0 %v1787_v7  ;;  %1653 = vmatprep.subr.bf16.mxu1 %v1788_v8  ;;  %v1823_v43 = vld [vmem:[#allocation2 + $0x68] sm:$0xff]   ;;  %v1825_v45 = vld [vmem:[#allocation2 + $0x70] sm:$0xff]   ;;  %v1826_v46 = vld [vmem:[#allocation5 + $0x78] sm:$0xff]  }
  0x59   :  { %1701 = vmatprep.subr.bf16.mxu0 %v1789_v9  ;;  %v1827_v47 = vld [vmem:[#allocation2 + $0x78] sm:$0xff]   ;;  %v1567_v48 = vld [vmem:[#allocation7 + $0x8] sm:$0xff]   ;;  %v1424_v49 = vld [vmem:[#allocation7] sm:$0xff]  }
  0x5a   :  { %v1429_v50 = vunpack.c.l.bf16 %v1567_v48  ;;  %v1425_v51 = vunpack.c.l.bf16 %v1424_v49  ;;  %v1569_v52 = vld [vmem:[#allocation7 + $0x18] sm:$0xff]   ;;  %v1430_v53 = vunpack.c.h.bf16 %v1567_v48  ;;  %v1568_v54 = vld [vmem:[#allocation7 + $0x10] sm:$0xff]   ;;  %v1426_v55 = vunpack.c.h.bf16 %v1424_v49  ;;  %v1571_v58 = vld [vmem:[#allocation7 + $0x28] sm:$0xff]  }
  0x5b   :  { %1654 = vmatpush3.bf16.msra.mxu1 %v1788_v8  ;;  %v1437_v56 = vunpack.c.l.bf16 %v1569_v52  ;;  %v1433_v57 = vunpack.c.l.bf16 %v1568_v54  ;;  %v1438_v59 = vunpack.c.h.bf16 %v1569_v52  ;;  %v1570_v60 = vld [vmem:[#allocation7 + $0x20] sm:$0xff]   ;;  %v1434_v61 = vunpack.c.h.bf16 %v1568_v54  ;;  %v1573_v0 = vld [vmem:[#allocation7 + $0x38] sm:$0xff]   ;;  %v1572_v2 = vld [vmem:[#allocation7 + $0x30] sm:$0xff]  }
  0x5c   :  { %1702 = vmatpush3.bf16.msra.mxu0 %v1789_v9  ;;  %1655 = vmatprep.subr.bf16.mxu1 %v1790_v10  ;;  %1828 = vtanh.f32 %v1429_v50  ;;  %v1445_v62 = vunpack.c.l.bf16 %v1571_v58  ;;  %v1441_v63 = vunpack.c.l.bf16 %v1570_v60  ;;  %v1446_v1 = vunpack.c.h.bf16 %v1571_v58  ;;  %v1575_v6 = vld [vmem:[#allocation7 + $0x48] sm:$0xff]   ;;  %v1574_v9 = vld [vmem:[#allocation7 + $0x40] sm:$0xff]  }
  0x5d   :  { %1703 = vmatprep.subr.bf16.mxu0 %v1791_v11  ;;  %1830 = vtanh.f32 %v1425_v51  ;;  %v1442_v3 = vunpack.c.h.bf16 %v1570_v60  ;;  %v1453_v4 = vunpack.c.l.bf16 %v1573_v0  ;;  %v1449_v5 = vunpack.c.l.bf16 %v1572_v2 }
  0x5e   :  { %1832 = vtanh.f32 %v1430_v53  ;;  %v1454_v8 = vunpack.c.h.bf16 %v1573_v0  ;;  %v1461_v13 = vunpack.c.l.bf16 %v1575_v6 }
  0x5f   :  { %1656 = vmatpush3.bf16.msra.mxu1 %v1790_v10  ;;  %1834 = vtanh.f32 %v1426_v55 }
  0x60   :  { %1704 = vmatpush3.bf16.msra.mxu0 %v1791_v11  ;;  %1657 = vmatprep.subr.bf16.mxu1 %v1792_v14  ;;  %1836 = vtanh.f32 %v1437_v56  ;;  %v1450_v11 = vunpack.c.h.bf16 %v1572_v2 }
  0x61   :  { %1705 = vmatprep.subr.bf16.mxu0 %v1793_v15  ;;  %1838 = vtanh.f32 %v1433_v57 }
  0x62   :  { %1840 = vtanh.f32 %v1438_v59 }
  0x63   :  { %1658 = vmatpush3.bf16.msra.mxu1 %v1792_v14  ;;  %1842 = vtanh.f32 %v1434_v61  ;;  %v2276_v61 = vld [vmem:[#allocation7 + $0x68] sm:$0xff]  }
  0x64   :  { %1706 = vmatpush3.bf16.msra.mxu0 %v1793_v15  ;;  %1659 = vmatprep.subr.bf16.mxu1 %v1794_v16  ;;  %1844 = vtanh.f32 %v1445_v62  ;;  %v1457_v15 = vunpack.c.l.bf16 %v1574_v9 }
  0x65   :  { %1707 = vmatprep.subr.bf16.mxu0 %v1795_v17  ;;  %1846 = vtanh.f32 %v1441_v63 }
  0x66   :  { %v2244_v7 = vpop.eup %1828  ;;  %1848 = vtanh.f32 %v1446_v1 }
  0x67   :  { %1660 = vmatpush3.bf16.msra.mxu1 %v1794_v16  ;;  %v2246_v10 = vpop.eup %1830  ;;  %1850 = vtanh.f32 %v1442_v3 }
  0x68   :  { %1708 = vmatpush3.bf16.msra.mxu0 %v1795_v17  ;;  %v2248_v12 = vpop.eup %1832  ;;  %1852 = vtanh.f32 %v1453_v4 }
  0x69   :  { %v2250_v14 = vpop.eup %1834  ;;  %1854 = vtanh.f32 %v1449_v5 }
  0x6a   :  { %1662 = vmatmul.mubr.bf16.vlgmr.msra.gmra.mrb[0].mxu1 %v1798_v18  ;;  %v2252_v16 = vpop.eup %1836  ;;  %1856 = vtanh.f32 %v1454_v8  ;;  %v1462_v18 = vunpack.c.h.bf16 %v1575_v6  ;;  %v1477_v8 = vunpack.c.l.bf16 %v2276_v61 }
  0x6b   :  { %1710 = vmatmul.mubr.bf16.vlgmr.msra.gmra.mrb[0].mxu0 %v1799_v19  ;;  %1665 = vmatprep.mubr.bf16.mxu1 %v1800_v20  ;;  %v2254_v19 = vpop.eup %1838  ;;  %1858 = vtanh.f32 %v1450_v11 }
  0x6c   :  { %1713 = vmatprep.mubr.bf16.mxu0 %v1801_v21  ;;  %1860 = vtanh.f32 %v1461_v13 }
  0x6d   :  { %1862 = vtanh.f32 %v1457_v15 }
  0x6e   :  { %1864 = vtanh.f32 %v1462_v18 }
  0x72   :  { %1666 = vmatmul.mubr.bf16.gmra.mrb[4].mxu1 %v1802_v22  ;;  %v1458_v22 = vunpack.c.h.bf16 %v1574_v9 }
  0x73   :  { %1714 = vmatmul.mubr.bf16.gmra.mrb[4].mxu0 %v1803_v23  ;;  %1669 = vmatprep.mubr.bf16.mxu1 %v1804_v24  ;;  %v2256_v23 = vpop.eup %1840 }
  0x74   :  { %1717 = vmatprep.mubr.bf16.mxu0 %v1805_v25  ;;  %1866 = vtanh.f32 %v1458_v22 }
  0x7a   :  { %1670 = vmatmul.mubr.bf16.gmra.mrb[8].mxu1 %v1806_v26 }
  0x7b   :  { %1718 = vmatmul.mubr.bf16.gmra.mrb[8].mxu0 %v1807_v27  ;;  %1673 = vmatprep.mubr.bf16.mxu1 %v1808_v28  ;;  %v2258_v27 = vpop.eup %1842 }
  0x7c   :  { %1721 = vmatprep.mubr.bf16.mxu0 %v1809_v29 }
  0x82   :  { %1674 = vmatmul.mubr.bf16.gmra.mrb[12].mxu1 %v1810_v30 }
  0x83   :  { %1722 = vmatmul.mubr.bf16.gmra.mrb[12].mxu0 %v1811_v31  ;;  %1677 = vmatprep.mubr.bf16.mxu1 %v1812_v32  ;;  %v1577_v31 = vld [vmem:[#allocation7 + $0x58] sm:$0xff]   ;;  %v2260_v32 = vpop.eup %1844 }
  0x84   :  { %1725 = vmatprep.mubr.bf16.mxu0 %v1813_v33  ;;  %v1470_v48 = vunpack.c.h.bf16 %v1577_v31 }
  0x8a   :  { %1678 = vmatmul.mubr.bf16.gmra.mrb[16].mxu1 %v1814_v34 }
  0x8b   :  { %1726 = vmatmul.mubr.bf16.gmra.mrb[16].mxu0 %v1815_v35  ;;  %1681 = vmatprep.mubr.bf16.mxu1 %v1816_v36  ;;  %v1576_v36 = vld [vmem:[#allocation7 + $0x50] sm:$0xff]  }
  0x8c   :  { %1729 = vmatprep.mubr.bf16.mxu0 %v1817_v37  ;;  %v2262_v37 = vpop.eup %1846  ;;  %v1466_v52 = vunpack.c.h.bf16 %v1576_v36 }
  0x92   :  { %1682 = vmatmul.mubr.bf16.gmra.mrb[20].mxu1 %v1818_v38 }
  0x93   :  { %1730 = vmatmul.mubr.bf16.gmra.mrb[20].mxu0 %v1819_v39  ;;  %1685 = vmatprep.mubr.bf16.mxu1 %v1820_v40  ;;  %v2264_v40 = vpop.eup %1848 }
  0x94   :  { %1733 = vmatprep.mubr.bf16.mxu0 %v1821_v41 }
  0x9a   :  { %1686 = vmatmul.mubr.bf16.gmra.mrb[24].mxu1 %v1822_v42  ;;  %v1469_v42 = vunpack.c.l.bf16 %v1577_v31 }
  0x9b   :  { %1734 = vmatmul.mubr.bf16.gmra.mrb[24].mxu0 %v1823_v43  ;;  %1689 = vmatprep.mubr.bf16.mxu1 %v1824_v44  ;;  %v2266_v43 = vpop.eup %1850 }
  0x9c   :  { %1737 = vmatprep.mubr.bf16.mxu0 %v1825_v45  ;;  %v1465_v45 = vunpack.c.l.bf16 %v1576_v36 }
  0xa2   :  { %1690 = vmatmul.mubr.bf16.gmra.mrb[28].mxu1 %v1826_v46  ;;  %v2268_v46 = vpop.eup %1852 }
  0xa3   :  { %1738 = vmatmul.mubr.bf16.gmra.mrb[28].mxu0 %v1827_v47  ;;  %v2270_v49 = vpop.eup %1854 }
  0xa4   :  { %v2272_v53 = vpop.eup %1856 }
  0xa5   :  { %v2274_v57 = vpop.eup %1858 }
  0xa6   :  { %v2278_v62 = vpop.eup %1860 }
  0xa7   :  { %v2280_v2 = vpop.eup %1862 }
  0xa8   :  { %v2282_v5 = vpop.eup %1864 }
  0xa9   :  { %v2285_v9 = vpop.eup %1866 }
 0x13d   :  { %v1663_v17 = vpop.f32.mrb[0].mxu1 }
 0x13e   :  { %v1711_v20 = vpop.f32.mrb[0].mxu0  ;;  %v348_v21 = vpop.f32.mrb[1].mxu1 }
 0x13f   :  { %v662_v24 = vadd.f32 %v1711_v20, %v1663_v17  ;;  %v653_v25 = vpop.f32.mrb[1].mxu0  ;;  %v1664_v26 = vpop.f32.mrb[2].mxu1 }
 0x140   :  { %v654_v28 = vadd.f32 %v653_v25, %v348_v21  ;;  %v1712_v29 = vpop.f32.mrb[2].mxu0  ;;  %v351_v30 = vpop.f32.mrb[3].mxu1 }
 0x141   :  { %v1329_v33 = vmul.f32 -1.442695, %v662_v24  ;;  %v665_v34 = vadd.f32 %v1712_v29, %v1664_v26  ;;  %v656_v35 = vpop.f32.mrb[3].mxu0 }
 0x142   :  { %v1327_v38 = vmul.f32 -1.442695, %v654_v28  ;;  %v657_v39 = vadd.f32 %v656_v35, %v351_v30 }
 0x143   :  { %1868 = vpow2.f32 %v1329_v33  ;;  %v1330_v41 = vmul.f32 -1.442695, %v665_v34 }
 0x144   :  { %1870 = vpow2.f32 %v1327_v38  ;;  %v1328_v44 = vmul.f32 -1.442695, %v657_v39 }
 0x145   :  { %1872 = vpow2.f32 %v1330_v41  ;;  %v1667_v47 = vpop.f32.mrb[4].mxu1 }
 0x146   :  { %1874 = vpow2.f32 %v1328_v44  ;;  %v1715_v50 = vpop.f32.mrb[4].mxu0  ;;  %v364_v51 = vpop.f32.mrb[5].mxu1 }
 0x147   :  { %v678_v54 = vadd.f32 %v1715_v50, %v1667_v47  ;;  %v669_v55 = vpop.f32.mrb[5].mxu0  ;;  %v1668_v56 = vpop.f32.mrb[6].mxu1  ;;  %1876 = vtanh.f32 %v1469_v42 }
 0x148   :  { %v670_v58 = vadd.f32 %v669_v55, %v364_v51  ;;  %v1716_v59 = vpop.f32.mrb[6].mxu0  ;;  %v367_v60 = vpop.f32.mrb[7].mxu1  ;;  %1878 = vtanh.f32 %v1465_v45 }
 0x149   :  { %v1333_v63 = vmul.f32 -1.442695, %v678_v54  ;;  %v681_v0 = vadd.f32 %v1716_v59, %v1668_v56  ;;  %v672_v1 = vpop.f32.mrb[7].mxu0  ;;  %1880 = vtanh.f32 %v1470_v48 }
 0x14a   :  { %v1331_v3 = vmul.f32 -1.442695, %v670_v58  ;;  %v673_v4 = vadd.f32 %v672_v1, %v367_v60  ;;  %1882 = vtanh.f32 %v1466_v52 }
 0x14b   :  { %1884 = vpow2.f32 %v1333_v63  ;;  %v1334_v6 = vmul.f32 -1.442695, %v681_v0 }
 0x14c   :  { %1886 = vpow2.f32 %v1331_v3  ;;  %v1332_v11 = vmul.f32 -1.442695, %v673_v4 }
 0x14d   :  { %v1869_v13 = vpop.eup %1868  ;;  %1888 = vpow2.f32 %v1334_v6  ;;  %v1671_v15 = vpop.f32.mrb[8].mxu1 }
 0x14e   :  { %v1871_v17 = vpop.eup %1870  ;;  %v878_v18 = vadd.f32 1.0, %v1869_v13  ;;  %1890 = vpow2.f32 %v1332_v11  ;;  %v1719_v20 = vpop.f32.mrb[8].mxu0 }
 0x14f   :  { %v380_v21 = vpop.f32.mrb[9].mxu1  ;;  %v1873_v22 = vpop.eup %1872  ;;  %v876_v24 = vadd.f32 1.0, %v1871_v17  ;;  %v694_v25 = vadd.f32 %v1719_v20, %v1671_v15  ;;  %1892 = vtanh.f32 %v1477_v8 }
 0x150   :  { %v685_v26 = vpop.f32.mrb[9].mxu0  ;;  %v1672_v28 = vpop.f32.mrb[10].mxu1  ;;  %1894 = vrcp.f32 %v878_v18  ;;  %v879_v30 = vadd.f32 1.0, %v1873_v22  ;;  %v2297_v22 = vld [vmem:[#allocation7 + $0x60] sm:$0xff]  }
 0x151   :  { %v1875_v29 = vpop.eup %1874  ;;  %v686_v31 = vadd.f32 %v685_v26, %v380_v21  ;;  %v1720_v33 = vpop.f32.mrb[10].mxu0  ;;  %1896 = vrcp.f32 %v876_v24  ;;  %v1337_v38 = vmul.f32 -1.442695, %v694_v25 }
 0x152   :  { %v383_v34 = vpop.f32.mrb[11].mxu1  ;;  %v2287_v35 = vpop.eup %1876  ;;  %v877_v36 = vadd.f32 1.0, %v1875_v29  ;;  %v697_v39 = vadd.f32 %v1720_v33, %v1672_v28  ;;  %1898 = vrcp.f32 %v879_v30  ;;  %v1473_v33 = vunpack.c.l.bf16 %v2297_v22 }
 0x153   :  { %v688_v41 = vpop.f32.mrb[11].mxu0  ;;  %v2289_v42 = vpop.eup %1878  ;;  %v1335_v44 = vmul.f32 -1.442695, %v686_v31 }
 0x154   :  { %v689_v45 = vadd.f32 %v688_v41, %v383_v34  ;;  %v2291_v47 = vpop.eup %1880  ;;  %1900 = vrcp.f32 %v877_v36  ;;  %v1338_v48 = vmul.f32 -1.442695, %v697_v39 }
 0x155   :  { %v2293_v50 = vpop.eup %1882  ;;  %1902 = vpow2.f32 %v1337_v38  ;;  %v1675_v54 = vpop.f32.mrb[12].mxu1 }
 0x156   :  { %v1336_v51 = vmul.f32 -1.442695, %v689_v45  ;;  %v1885_v52 = vpop.eup %1884  ;;  %1904 = vpow2.f32 %v1335_v44  ;;  %v1723_v58 = vpop.f32.mrb[12].mxu0 }
 0x157   :  { %v1887_v55 = vpop.eup %1886  ;;  %v882_v56 = vadd.f32 1.0, %v1885_v52  ;;  %1906 = vpow2.f32 %v1338_v48  ;;  %v396_v59 = vpop.f32.mrb[13].mxu1  ;;  %v710_v0 = vadd.f32 %v1723_v58, %v1675_v54 }
 0x158   :  { %v1889_v60 = vpop.eup %1888  ;;  %v880_v63 = vadd.f32 1.0, %v1887_v55  ;;  %1908 = vpow2.f32 %v1336_v51  ;;  %v701_v1 = vpop.f32.mrb[13].mxu0 }
 0x159   :  { %v1676_v3 = vpop.f32.mrb[14].mxu1  ;;  %v1891_v4 = vpop.eup %1890  ;;  %1910 = vrcp.f32 %v882_v56  ;;  %v883_v6 = vadd.f32 1.0, %v1889_v60  ;;  %v702_v8 = vadd.f32 %v701_v1, %v396_v59  ;;  %v1341_v18 = vmul.f32 -1.442695, %v710_v0 }
 0x15a   :  { %v1724_v11 = vpop.f32.mrb[14].mxu0  ;;  %v399_v13 = vpop.f32.mrb[15].mxu1  ;;  %1912 = vrcp.f32 %v880_v63  ;;  %v881_v17 = vadd.f32 1.0, %v1891_v4 }
 0x15b   :  { %v2295_v15 = vpop.eup %1892  ;;  %v713_v20 = vadd.f32 %v1724_v11, %v1676_v3  ;;  %v704_v21 = vpop.f32.mrb[15].mxu0  ;;  %1914 = vrcp.f32 %v883_v6  ;;  %v1339_v25 = vmul.f32 -1.442695, %v702_v8 }
 0x15c   :  { %v1895_v24 = vpop.eup %1894  ;;  %v705_v26 = vadd.f32 %v704_v21, %v399_v13  ;;  %1916 = vrcp.f32 %v881_v17 }
 0x15d   :  { %v1897_v28 = vpop.eup %1896  ;;  %v1342_v29 = vmul.f32 -1.442695, %v713_v20  ;;  %1918 = vpow2.f32 %v1341_v18  ;;  %v1070_v36 = vmul.f32 %v1895_v24, %v2244_v7  ;;  %v1679_v39 = vpop.f32.mrb[16].mxu1 }
 0x15e   :  { %v1899_v30 = vpop.eup %1898  ;;  %v1340_v31 = vmul.f32 -1.442695, %v705_v26  ;;  %1920 = vpow2.f32 %v1339_v25  ;;  %v1068_v44 = vmul.f32 %v1897_v28, %v2246_v10  ;;  %v1727_v48 = vpop.f32.mrb[16].mxu0 }
 0x15f   :  { %v1901_v34 = vpop.eup %1900  ;;  %v1071_v38 = vmul.f32 %v1899_v30, %v2248_v12  ;;  %1922 = vpow2.f32 %v1342_v29  ;;  %v412_v51 = vpop.f32.mrb[17].mxu1  ;;  %v726_v56 = vadd.f32 %v1727_v48, %v1679_v39 }
 0x160   :  { %v1903_v41 = vpop.eup %1902  ;;  %v1069_v45 = vmul.f32 %v1901_v34, %v2250_v14  ;;  %1924 = vpow2.f32 %v1340_v31  ;;  %v717_v58 = vpop.f32.mrb[17].mxu0 }
 0x161   :  { %v1905_v52 = vpop.eup %1904  ;;  %v1495_v54 = vpack.c.bf16 %v1071_v38, %v1070_v36  ;;  %v886_v55 = vadd.f32 1.0, %v1903_v41  ;;  %v1680_v59 = vpop.f32.mrb[18].mxu1  ;;  %v718_v63 = vadd.f32 %v717_v58, %v412_v51  ;;  %1926 = vtanh.f32 %v1473_v33 }
 0x162   :  { %v1907_v7 = vpop.eup %1906  ;;  %v1490_v60 = vpack.c.bf16 %v1069_v45, %v1068_v44  ;;  %v884_v12 = vadd.f32 1.0, %v1905_v52  ;;  %v1728_v0 = vpop.f32.mrb[18].mxu0  ;;  %v1345_v3 = vmul.f32 -1.442695, %v726_v56 }
 0x163   :  { %v415_v1 = vpop.f32.mrb[19].mxu1  ;;  %v1909_v10 = vpop.eup %1908  ;;  %1582 = vst [vmem:[#allocation10 + $0x8] sm:$0xff] %v1495_v54   ;;  %1928 = vrcp.f32 %v886_v55  ;;  %v887_v14 = vadd.f32 1.0, %v1907_v7  ;;  %v729_v4 = vadd.f32 %v1728_v0, %v1680_v59  ;;  %v1343_v13 = vmul.f32 -1.442695, %v718_v63 }
 0x164   :  { %v720_v6 = vpop.f32.mrb[19].mxu0  ;;  %v1911_v8 = vpop.eup %1910  ;;  %1491 = vst [vmem:[#allocation10] sm:$0xff] %v1490_v60   ;;  %1930 = vrcp.f32 %v884_v12  ;;  %v885_v11 = vadd.f32 1.0, %v1909_v10 }
 0x165   :  { %v721_v17 = vadd.f32 %v720_v6, %v415_v1  ;;  %v1913_v18 = vpop.eup %1912  ;;  %1932 = vrcp.f32 %v887_v14  ;;  %v1346_v20 = vmul.f32 -1.442695, %v729_v4  ;;  %v1074_v26 = vmul.f32 %v1911_v8, %v2252_v16  ;;  %v1683_v29 = vpop.f32.mrb[20].mxu1 }
 0x166   :  { %v1915_v21 = vpop.eup %1914  ;;  %1934 = vrcp.f32 %v885_v11  ;;  %v1072_v31 = vmul.f32 %v1913_v18, %v2254_v19  ;;  %v1731_v34 = vpop.f32.mrb[20].mxu0  ;;  %v1478_v6 = vunpack.c.h.bf16 %v2276_v61 }
 0x167   :  { %v1344_v24 = vmul.f32 -1.442695, %v721_v17  ;;  %v1917_v25 = vpop.eup %1916  ;;  %v1075_v28 = vmul.f32 %v1915_v21, %v2256_v23  ;;  %1936 = vpow2.f32 %v1345_v3  ;;  %v428_v36 = vpop.f32.mrb[21].mxu1  ;;  %v742_v44 = vadd.f32 %v1731_v34, %v1683_v29 }
 0x168   :  { %v1919_v30 = vpop.eup %1918  ;;  %v1073_v33 = vmul.f32 %v1917_v25, %v2258_v27  ;;  %1938 = vpow2.f32 %v1343_v13  ;;  %v733_v45 = vpop.f32.mrb[21].mxu0 }
 0x169   :  { %v1921_v38 = vpop.eup %1920  ;;  %v1505_v39 = vpack.c.bf16 %v1075_v28, %v1074_v26  ;;  %v890_v41 = vadd.f32 1.0, %v1919_v30  ;;  %1940 = vpow2.f32 %v1346_v20  ;;  %v1684_v48 = vpop.f32.mrb[22].mxu1  ;;  %v734_v52 = vadd.f32 %v733_v45, %v428_v36 }
 0x16a   :  { %v1923_v16 = vpop.eup %1922  ;;  %v1500_v51 = vpack.c.bf16 %v1073_v33, %v1072_v31  ;;  %v888_v23 = vadd.f32 1.0, %v1921_v38  ;;  %1942 = vpow2.f32 %v1344_v24  ;;  %v1732_v54 = vpop.f32.mrb[22].mxu0  ;;  %v1349_v56 = vmul.f32 -1.442695, %v742_v44 }
 0x16b   :  { %v431_v55 = vpop.f32.mrb[23].mxu1  ;;  %v1925_v19 = vpop.eup %1924  ;;  %1584 = vst [vmem:[#allocation10 + $0x18] sm:$0xff] %v1505_v39   ;;  %1944 = vrcp.f32 %v890_v41  ;;  %v891_v27 = vadd.f32 1.0, %v1923_v16  ;;  %v745_v58 = vadd.f32 %v1732_v54, %v1684_v48  ;;  %v1347_v12 = vmul.f32 -1.442695, %v734_v52 }
 0x16c   :  { %v736_v59 = vpop.f32.mrb[23].mxu0  ;;  %v2308_v7 = vpop.eup %1926  ;;  %1583 = vst [vmem:[#allocation10 + $0x10] sm:$0xff] %v1500_v51   ;;  %1946 = vrcp.f32 %v888_v23  ;;  %v889_v60 = vadd.f32 1.0, %v1925_v19 }
 0x16d   :  { %v737_v63 = vadd.f32 %v736_v59, %v431_v55  ;;  %v1929_v0 = vpop.eup %1928  ;;  %1948 = vrcp.f32 %v891_v27  ;;  %v1350_v1 = vmul.f32 -1.442695, %v745_v58  ;;  %v1687_v4 = vpop.f32.mrb[24].mxu1 }
 0x16e   :  { %v1931_v10 = vpop.eup %1930  ;;  %1950 = vrcp.f32 %v889_v60  ;;  %v1078_v11 = vmul.f32 %v1929_v0, %v2260_v32  ;;  %v1735_v17 = vpop.f32.mrb[24].mxu0 }
 0x16f   :  { %v1348_v14 = vmul.f32 -1.442695, %v737_v63  ;;  %v1933_v3 = vpop.eup %1932  ;;  %1952 = vpow2.f32 %v1349_v56  ;;  %v444_v18 = vpop.f32.mrb[25].mxu1  ;;  %v1076_v21 = vmul.f32 %v1931_v10, %v2262_v37  ;;  %v758_v25 = vadd.f32 %v1735_v17, %v1687_v4 }
 0x170   :  { %v1935_v8 = vpop.eup %1934  ;;  %v1079_v13 = vmul.f32 %v1933_v3, %v2264_v40  ;;  %1954 = vpow2.f32 %v1347_v12  ;;  %v749_v26 = vpop.f32.mrb[25].mxu0 }
 0x171   :  { %v1937_v20 = vpop.eup %1936  ;;  %v1077_v24 = vmul.f32 %v1935_v8, %v2266_v43  ;;  %1956 = vpow2.f32 %v1350_v1  ;;  %v1688_v28 = vpop.f32.mrb[26].mxu1  ;;  %v750_v31 = vadd.f32 %v749_v26, %v444_v18  ;;  %v1353_v41 = vmul.f32 -1.442695, %v758_v25 }
 0x172   :  { %v1939_v29 = vpop.eup %1938  ;;  %v1515_v30 = vpack.c.bf16 %v1079_v13, %v1078_v11  ;;  %v894_v61 = vadd.f32 1.0, %v1937_v20  ;;  %1958 = vpow2.f32 %v1348_v14  ;;  %v1736_v32 = vpop.f32.mrb[26].mxu0 }
 0x173   :  { %v447_v33 = vpop.f32.mrb[27].mxu1  ;;  %v1941_v40 = vpop.eup %1940  ;;  %v1510_v34 = vpack.c.bf16 %v1077_v24, %v1076_v21  ;;  %v892_v36 = vadd.f32 1.0, %v1939_v29  ;;  %v761_v38 = vadd.f32 %v1736_v32, %v1688_v28  ;;  %1960 = vtanh.f32 %v1478_v6 }
 0x174   :  { %v752_v39 = vpop.f32.mrb[27].mxu0  ;;  %v1943_v37 = vpop.eup %1942  ;;  %1586 = vst [vmem:[#allocation10 + $0x28] sm:$0xff] %v1515_v30   ;;  %1962 = vrcp.f32 %v894_v61  ;;  %v895_v43 = vadd.f32 1.0, %v1941_v40  ;;  %v1351_v16 = vmul.f32 -1.442695, %v750_v31  ;;  %v1474_v32 = vunpack.c.h.bf16 %v2297_v22 }
 0x175   :  { %v753_v44 = vadd.f32 %v752_v39, %v447_v33  ;;  %v1945_v45 = vpop.eup %1944  ;;  %1585 = vst [vmem:[#allocation10 + $0x20] sm:$0xff] %v1510_v34   ;;  %1964 = vrcp.f32 %v892_v36  ;;  %v893_v48 = vadd.f32 1.0, %v1943_v37  ;;  %v1354_v23 = vmul.f32 -1.442695, %v761_v38  ;;  %v1691_v55 = vpop.f32.mrb[28].mxu1  ;;  %v1581_v37 = vld [vmem:[#allocation7 + $0x78] sm:$0xff]  }
 0x176   :  { %v1947_v51 = vpop.eup %1946  ;;  %1966 = vrcp.f32 %v895_v43  ;;  %v1082_v27 = vmul.f32 %v1945_v45, %v2268_v46  ;;  %v1739_v58 = vpop.f32.mrb[28].mxu0  ;;  %v1580_v45 = vld [vmem:[#allocation7 + $0x70] sm:$0xff]  }
 0x177   :  { %v1949_v52 = vpop.eup %1948  ;;  %1968 = vrcp.f32 %v893_v48  ;;  %v1352_v54 = vmul.f32 -1.442695, %v753_v44  ;;  %v460_v59 = vpop.f32.mrb[29].mxu1  ;;  %v1080_v12 = vmul.f32 %v1947_v51, %v2270_v49  ;;  %v774_v0 = vadd.f32 %v1739_v58, %v1691_v55 }
 0x178   :  { %v1951_v19 = vpop.eup %1950  ;;  %v1083_v56 = vmul.f32 %v1949_v52, %v2272_v53  ;;  %1970 = vpow2.f32 %v1353_v41  ;;  %v765_v1 = vpop.f32.mrb[29].mxu0  ;;  %v1485_v51 = vunpack.c.l.bf16 %v1581_v37 }
 0x179   :  { %v1953_v60 = vpop.eup %1952  ;;  %v1081_v63 = vmul.f32 %v1951_v19, %v2274_v57  ;;  %1972 = vpow2.f32 %v1351_v16  ;;  %v1692_v10 = vpop.f32.mrb[30].mxu1  ;;  %v766_v6 = vadd.f32 %v765_v1, %v460_v59  ;;  %v1357_v57 = vmul.f32 -1.442695, %v774_v0 }
 0x17a   :  { %v1955_v14 = vpop.eup %1954  ;;  %v1525_v3 = vpack.c.bf16 %v1083_v56, %v1082_v27  ;;  %v898_v4 = vadd.f32 1.0, %v1953_v60  ;;  %1974 = vpow2.f32 %v1354_v23  ;;  %v1740_v46 = vpop.f32.mrb[30].mxu0  ;;  %v1482_v19 = vunpack.c.h.bf16 %v1580_v45 }
 0x17b   :  { %v463_v8 = vpop.f32.mrb[31].mxu1  ;;  %v1957_v53 = vpop.eup %1956  ;;  %v1520_v11 = vpack.c.bf16 %v1081_v63, %v1080_v12  ;;  %v896_v13 = vadd.f32 1.0, %v1955_v14  ;;  %1976 = vpow2.f32 %v1352_v54  ;;  %v777_v20 = vadd.f32 %v1740_v46, %v1692_v10 }
 0x17c   :  { %v768_v17 = vpop.f32.mrb[31].mxu0  ;;  %v1959_v18 = vpop.eup %1958  ;;  %1588 = vst [vmem:[#allocation10 + $0x38] sm:$0xff] %v1525_v3   ;;  %1978 = vrcp.f32 %v898_v4  ;;  %v899_v49 = vadd.f32 1.0, %v1957_v53  ;;  %v1355_v25 = vmul.f32 -1.442695, %v766_v6  ;;  %v1486_v54 = vunpack.c.h.bf16 %v1581_v37 }
 0x17d   :  { %v2319_v21 = vpop.eup %1960  ;;  %1587 = vst [vmem:[#allocation10 + $0x30] sm:$0xff] %v1520_v11   ;;  %1980 = vrcp.f32 %v896_v13  ;;  %v897_v24 = vadd.f32 1.0, %v1959_v18  ;;  %v769_v26 = vadd.f32 %v768_v17, %v463_v8  ;;  %v1358_v29 = vmul.f32 -1.442695, %v777_v20 }
 0x17e   :  { %v1963_v28 = vpop.eup %1962  ;;  %1982 = vrcp.f32 %v899_v49 }
 0x17f   :  { %v1965_v30 = vpop.eup %1964  ;;  %1984 = vrcp.f32 %v897_v24  ;;  %v1356_v61 = vmul.f32 -1.442695, %v769_v26  ;;  %v1086_v40 = vmul.f32 %v1963_v28, %v2278_v62 }
 0x180   :  { %v1967_v31 = vpop.eup %1966  ;;  %1986 = vpow2.f32 %v1357_v57  ;;  %v1084_v38 = vmul.f32 %v1965_v30, %v2280_v2 }
 0x181   :  { %v1969_v33 = vpop.eup %1968  ;;  %v1087_v34 = vmul.f32 %v1967_v31, %v2282_v5  ;;  %1988 = vpow2.f32 %v1355_v25 }
 0x182   :  { %v1971_v36 = vpop.eup %1970  ;;  %v1085_v39 = vmul.f32 %v1969_v33, %v2285_v9  ;;  %1990 = vpow2.f32 %v1358_v29  ;;  %v1481_v9 = vunpack.c.l.bf16 %v1580_v45 }
 0x183   :  { %v1973_v43 = vpop.eup %1972  ;;  %v1535_v41 = vpack.c.bf16 %v1087_v34, %v1086_v40  ;;  %v902_v44 = vadd.f32 1.0, %v1971_v36  ;;  %1992 = vpow2.f32 %v1356_v61 }
 0x184   :  { %v1975_v22 = vpop.eup %1974  ;;  %v1530_v48 = vpack.c.bf16 %v1085_v39, %v1084_v38  ;;  %v900_v16 = vadd.f32 1.0, %v1973_v43  ;;  %1994 = vtanh.f32 %v1474_v32 }
 0x185   :  { %v1977_v62 = vpop.eup %1976  ;;  %1590 = vst [vmem:[#allocation10 + $0x48] sm:$0xff] %v1535_v41   ;;  %1996 = vrcp.f32 %v902_v44  ;;  %v903_v5 = vadd.f32 1.0, %v1975_v22 }
 0x186   :  { %v1979_v23 = vpop.eup %1978  ;;  %1589 = vst [vmem:[#allocation10 + $0x40] sm:$0xff] %v1530_v48   ;;  %1998 = vrcp.f32 %v900_v16  ;;  %v901_v2 = vadd.f32 1.0, %v1977_v62 }
 0x187   :  { %v1981_v52 = vpop.eup %1980  ;;  %2000 = vrcp.f32 %v903_v5  ;;  %v1090_v56 = vmul.f32 %v1979_v23, %v2287_v35 }
 0x188   :  { %v1983_v55 = vpop.eup %1982  ;;  %2002 = vrcp.f32 %v901_v2  ;;  %v1088_v60 = vmul.f32 %v1981_v52, %v2289_v42 }
 0x189   :  { %v1985_v27 = vpop.eup %1984  ;;  %v1091_v58 = vmul.f32 %v1983_v55, %v2291_v47  ;;  %2004 = vtanh.f32 %v1485_v51 }
 0x18a   :  { %v1987_v59 = vpop.eup %1986  ;;  %v1089_v12 = vmul.f32 %v1985_v27, %v2293_v50  ;;  %2006 = vtanh.f32 %v1481_v9 }
 0x18b   :  { %v1989_v63 = vpop.eup %1988  ;;  %v1545_v0 = vpack.c.bf16 %v1091_v58, %v1090_v56  ;;  %v906_v1 = vadd.f32 1.0, %v1987_v59  ;;  %2008 = vtanh.f32 %v1486_v54 }
 0x18c   :  { %v1991_v10 = vpop.eup %1990  ;;  %v1540_v14 = vpack.c.bf16 %v1089_v12, %v1088_v60  ;;  %v904_v3 = vadd.f32 1.0, %v1989_v63  ;;  %2010 = vtanh.f32 %v1482_v19 }
 0x18d   :  { %v1993_v4 = vpop.eup %1992  ;;  %1592 = vst [vmem:[#allocation10 + $0x58] sm:$0xff] %v1545_v0   ;;  %2012 = vrcp.f32 %v906_v1  ;;  %v907_v35 = vadd.f32 1.0, %v1991_v10 }
 0x18e   :  { %v1995_v47 = vpop.eup %1994  ;;  %1591 = vst [vmem:[#allocation10 + $0x50] sm:$0xff] %v1540_v14   ;;  %2014 = vrcp.f32 %v904_v3  ;;  %v905_v6 = vadd.f32 1.0, %v1993_v4 }
 0x18f   :  { %v1997_v42 = vpop.eup %1996  ;;  %2016 = vrcp.f32 %v907_v35 }
 0x190   :  { %v1999_v50 = vpop.eup %1998  ;;  %2018 = vrcp.f32 %v905_v6  ;;  %v1094_v53 = vmul.f32 %v1997_v42, %v2295_v15 }
 0x191   :  { %v2001_v46 = vpop.eup %2000  ;;  %v1092_v17 = vmul.f32 %v1999_v50, %v2308_v7 }
 0x192   :  { %v2003_v8 = vpop.eup %2002  ;;  %v1095_v11 = vmul.f32 %v2001_v46, %v2319_v21 }
 0x193   :  { %v2005_v13 = vpop.eup %2004  ;;  %v1093_v18 = vmul.f32 %v2003_v8, %v1995_v47 }
 0x194   :  { %v2007_v49 = vpop.eup %2006  ;;  %v1555_v57 = vpack.c.bf16 %v1095_v11, %v1094_v53 }
 0x195   :  { %v2009_v20 = vpop.eup %2008  ;;  %v1550_v24 = vpack.c.bf16 %v1093_v18, %v1092_v17 }
 0x196   :  { %v2011_v25 = vpop.eup %2010  ;;  %1594 = vst [vmem:[#allocation10 + $0x68] sm:$0xff] %v1555_v57  }
 0x197   :  { %v2013_v26 = vpop.eup %2012  ;;  %1593 = vst [vmem:[#allocation10 + $0x60] sm:$0xff] %v1550_v24  }
 0x198   :  { %v2015_v28 = vpop.eup %2014  ;;  %v1098_v61 = vmul.f32 %v2013_v26, %v2005_v13 }
 0x199   :  { %v2017_v29 = vpop.eup %2016  ;;  %v1096_v15 = vmul.f32 %v2015_v28, %v2007_v49 }
 0x19a   :  { %v2019_v30 = vpop.eup %2018  ;;  %v1099_v31 = vmul.f32 %v2017_v29, %v2009_v20 }
 0x19b   :  { %v1097_v21 = vmul.f32 %v2019_v30, %v2011_v25 }
 0x19c   :  { %v1565_v32 = vpack.c.bf16 %v1099_v31, %v1098_v61 }
 0x19d   :  { %v1560_v7 = vpack.c.bf16 %v1097_v21, %v1096_v15 }
 0x19e   :  { %1596 = vst [vmem:[#allocation10 + $0x78] sm:$0xff] %v1565_v32  }
 0x19f   :  { %1595 = vst [vmem:[#allocation10 + $0x70] sm:$0xff] %v1560_v7  }
 0x1a0   :  { %2119 = shalt.err (!%p2116_p8)
}
 0x1a1   :  { %s2120_s15 = scalar_lea.hbm %s2352_s4, 2048 }
 0x1a2   :  { %p2121_p9 = scmp.ne.s32.totalorder %s2352_s4, %s2120_s15  ;;  %p2124_p10 = scmp.lt.u32.totalorder %s2120_s15, %s2352_s4 }
 0x1a4   :  { %p2126_p11 = pnand %p2124_p10, %p2121_p9 }
 0x1a6   :  { %2129 = shalt.err (!%p2126_p11)
}
 0x1a7   :  { %1271 = dma.vmem_to_hbm [thread:$0]  %s1266_s12, 2048, %s2352_s4, [#allocation4], %s2140_s27, %s2140_s27, %s2141_s28  }
 0x1a8   :  { %2136 = dma.done.wait [#allocation4], 2048  }
 0x1a9   :  { %2137 = vsyncadd [#allocation4], 4294965248 }
 0x1aa   :  { %1275 = vsyncpa [#allocation3], 1 }
 0x1ab   :  { %1276 = vsyncpa [#allocation6], 1 }
 0x1ac   :  { %1277 = vsyncpa [#allocation9], 1 }
 0x1ad   :  { %1278 = vsyncpa [#allocation4], 1 }

</bundles_post_ra>
